<compile_context>
chip_gen: v5e
topology: v5e:2x2
jax: 0.10.0
libtpu: 0.0.40
codegen_flags: <defaults>
</compile_context>

<pallas_src>
import jax
import jax.numpy as jnp
from jax import lax
from jax.experimental import pallas as pl
from jax.experimental.pallas import tpu as pltpu


def _nonlocal_kernel(xq_ref, xkv_ref,
                     wg_ref, bg_ref,      # (Ci, C), (Ci, 1)   g
                     wt_ref, bt_ref,      # (Ci, C), (Ci, 1)   theta
                     wp_ref, bp_ref,      # (Ci, C), (Ci, 1)   phi
                     ww_ref, bw_ref,      # (C, Ci), (C, 1)    W
                     o_ref,               # (1, C, TQ) output block
                     theta_scr,           # (Ci, TQ) f32  theta tile (resident across KV)
                     m_scr,               # (1, TQ)  f32  running max
                     l_scr,               # (1, TQ)  f32  running sum
                     acc_scr):            # (Ci, TQ) f32  y accumulator
    ki = pl.program_id(2)
    nk = pl.num_programs(2)

    @pl.when(ki == 0)
    def _init():
        x_q = xq_ref[0]                                                 # (C, TQ)
        theta_scr[...] = (jnp.dot(wt_ref[...], x_q,
                                  preferred_element_type=jnp.float32)
                          + bt_ref[...])
        m_scr[...] = jnp.full(m_scr.shape, -jnp.inf, dtype=jnp.float32)
        l_scr[...] = jnp.zeros(l_scr.shape, dtype=jnp.float32)
        acc_scr[...] = jnp.zeros(acc_scr.shape, dtype=jnp.float32)

    x_kv = xkv_ref[0]                                                   # (C, TK)
    # KV-side 1x1-conv projections (per-pixel linear layers), f32 accumulation.
    phi = (jnp.dot(wp_ref[...], x_kv, preferred_element_type=jnp.float32)
           + bp_ref[...])                                               # (Ci, TK)
    g = (jnp.dot(wg_ref[...], x_kv, preferred_element_type=jnp.float32)
         + bg_ref[...])                                                 # (Ci, TK)

    theta = theta_scr[...]                                              # (Ci, TQ)

    # scores s[k, q] = sum_c phi[c, k] * theta[c, q]  (bf16 operands, f32 acc)
    s = lax.dot_general(phi.astype(jnp.bfloat16), theta.astype(jnp.bfloat16),
                        dimension_numbers=(((0,), (0,)), ((), ())),
                        preferred_element_type=jnp.float32)             # (TK, TQ)

    # Online (flash) softmax update over the KV axis.
    m_prev = m_scr[...]                                                 # (1, TQ)
    m_new = jnp.maximum(m_prev, jnp.max(s, axis=0, keepdims=True))
    alpha = jnp.exp(m_prev - m_new)                                     # (1, TQ)
    p = jnp.exp(s - m_new)                                              # (TK, TQ)
    l_scr[...] = alpha * l_scr[...] + jnp.sum(p, axis=0, keepdims=True)
    acc_scr[...] = alpha * acc_scr[...] + jnp.dot(
        g.astype(jnp.bfloat16), p.astype(jnp.bfloat16),
        preferred_element_type=jnp.float32)                             # (Ci, TQ)
    m_scr[...] = m_new

    @pl.when(ki == nk - 1)
    def _finalize():
        x_q = xq_ref[0]                                                 # (C, TQ)
        y = acc_scr[...] * pl.reciprocal(l_scr[...], approx=True)       # (Ci, TQ)
        w_y = (jnp.dot(ww_ref[...], y, preferred_element_type=jnp.float32)
               + bw_ref[...])                                           # (C, TQ)
        o_ref[0] = (w_y + x_q).astype(o_ref.dtype)


def _device_kind():
    try:
        return jax.devices()[0].device_kind.lower()
    except Exception:
        return ""


def _pick_tile(n, preferred):
    if preferred <= n and n % preferred == 0:
        return preferred
    if n % 128 == 0:
        return 128
    return n   # small / odd N: one full-extent tile (block == full array dim)


def nonlocal_block(x_nchw, params, *, tq=None, tk=None):
    """Non-local block forward.  x_nchw: (B, C, H, W) float32."""
    B, C, H, W = x_nchw.shape
    Ci = C // 2
    N = H * W

    # NCHW -> (B, C, N): a pure reshape (no transpose / extra HBM pass).
    x_bcn = x_nchw.reshape(B, C, N)

    kind = _device_kind()
    is_v7 = ("v7" in kind) or ("7x" in kind)
    preferred = 128 if is_v7 else 256        # smaller query tile on v7x (64 MiB VMEM)
    if tq is None:
        tq = _pick_tile(N, preferred)
    if tk is None:
        tk = _pick_tile(N, preferred)
    nq, nk = N // tq, N // tk

    bg = params["bg"].reshape(Ci, 1)
    bt = params["bt"].reshape(Ci, 1)
    bp = params["bp"].reshape(Ci, 1)
    bw = params["bw"].reshape(C, 1)

    def _full(shape):
        nd = len(shape)
        return pl.BlockSpec(shape, lambda b, qi, ki: (0,) * nd)

    cost = pl.CostEstimate(
        flops=int(B * (3 * 2 * Ci * C * N        # g / theta / phi projections
                       + 2 * 2 * Ci * N * N      # scores + aggregation
                       + 2 * C * Ci * N)),       # output projection
        transcendentals=int(B * N * N),          # exp in softmax
        bytes_accessed=int(4 * (2 * B * C * N + B * C * N * nq + 4 * C * Ci)),
    )

    vmem_limit = (48 if is_v7 else 96) * 1024 * 1024

    out_bcn = pl.pallas_call(
        _nonlocal_kernel,
        out_shape=jax.ShapeDtypeStruct((B, C, N), x_bcn.dtype),
        grid_spec=pltpu.PrefetchScalarGridSpec(
            num_scalar_prefetch=0,
            grid=(B, nq, nk),
            in_specs=[
                pl.BlockSpec((1, C, tq), lambda b, qi, ki: (b, 0, qi)),  # query tile
                pl.BlockSpec((1, C, tk), lambda b, qi, ki: (b, 0, ki)),  # kv tile
                _full((Ci, C)), _full((Ci, 1)),      # g
                _full((Ci, C)), _full((Ci, 1)),      # theta
                _full((Ci, C)), _full((Ci, 1)),      # phi
                _full((C, Ci)), _full((C, 1)),       # W
            ],
            out_specs=pl.BlockSpec((1, C, tq), lambda b, qi, ki: (b, 0, qi)),
            scratch_shapes=[
                pltpu.VMEM((Ci, tq), jnp.float32),   # theta tile
                pltpu.VMEM((1, tq), jnp.float32),    # running max
                pltpu.VMEM((1, tq), jnp.float32),    # running sum
                pltpu.VMEM((Ci, tq), jnp.float32),   # y accumulator
            ]),
        compiler_params=pltpu.CompilerParams(
            dimension_semantics=("parallel", "parallel", "arbitrary"),
            vmem_limit_bytes=vmem_limit),
        cost_estimate=cost,
    )(x_bcn, x_bcn,
      params["wg"], bg, params["wt"], bt, params["wp"], bp, params["ww"], bw)

    return out_bcn.reshape(B, C, H, W)


def _reference(x_nchw, params):
    """Pure-JAX reference mirroring the PyTorch forward (for sanity check)."""
    B, C, H, W = x_nchw.shape
    N = H * W
    x = x_nchw.reshape(B, C, N)                                # (B, C, N)

    def conv1x1(xf, w, b):                                     # xf: (B, Cin, N)
        return jnp.einsum("oc,bcn->bon", w, xf) + b[None, :, None]

    g_x = conv1x1(x, params["wg"], params["bg"]).transpose(0, 2, 1)      # (B, N, Ci)
    theta_x = conv1x1(x, params["wt"], params["bt"]).transpose(0, 2, 1)  # (B, N, Ci)
    phi_x = conv1x1(x, params["wp"], params["bp"])                       # (B, Ci, N)
    f = jnp.einsum("bnc,bcm->bnm", theta_x, phi_x)
    f_div_c = jax.nn.softmax(f, axis=-1)
    y = jnp.einsum("bnm,bmc->bnc", f_div_c, g_x).transpose(0, 2, 1)      # (B, Ci, N)
    w_y = conv1x1(y, params["ww"], params["bw"])                         # (B, C, N)
    return (w_y + x).reshape(B, C, H, W)


if __name__ == "__main__":
    B, C, H, W = 2, 4, 16, 16
    Ci = C // 2

    key = jax.random.PRNGKey(0)
    kx, kg, kbg, kt, kbt, kp, kbp, kw, kbw = jax.random.split(key, 9)

    x = jax.random.normal(kx, (B, C, H, W), dtype=jnp.float32)

    # NOTE: the PyTorch module zero-initializes W and its bias; we use small
    # random values here so the correctness check exercises the full path.
    params = {
        "wg": jax.random.normal(kg, (Ci, C), dtype=jnp.float32) * 0.1,
        "bg": jax.random.normal(kbg, (Ci,), dtype=jnp.float32) * 0.1,
        "wt": jax.random.normal(kt, (Ci, C), dtype=jnp.float32) * 0.1,
        "bt": jax.random.normal(kbt, (Ci,), dtype=jnp.float32) * 0.1,
        "wp": jax.random.normal(kp, (Ci, C), dtype=jnp.float32) * 0.1,
        "bp": jax.random.normal(kbp, (Ci,), dtype=jnp.float32) * 0.1,
        "ww": jax.random.normal(kw, (C, Ci), dtype=jnp.float32) * 0.1,
        "bw": jax.random.normal(kbw, (C,), dtype=jnp.float32) * 0.1,
    }

    out = nonlocal_block(x, params)
    out = jax.block_until_ready(out)

    ref = _reference(x, params)
    assert out.shape == (B, C, H, W)
    # bf16 MXU operands + approx reciprocal -> slightly looser tolerance.
    assert jnp.allclose(out, ref, atol=1e-2, rtol=1e-2), "mismatch vs reference"

    print("KERNEL_OK")
</pallas_src>

<mosaic_0001>
module attributes {stable_mosaic.version = 11 : i64} {
  func.func @_nonlocal_kernel(%arg0: i32, %arg1: i32, %arg2: i32, %arg3: memref<1x4x256xf32, #tpu.memory_space<vmem>>, %arg4: memref<1x4x256xf32, #tpu.memory_space<vmem>>, %arg5: memref<2x4xf32, #tpu.memory_space<vmem>>, %arg6: memref<2x1xf32, #tpu.memory_space<vmem>>, %arg7: memref<2x4xf32, #tpu.memory_space<vmem>>, %arg8: memref<2x1xf32, #tpu.memory_space<vmem>>, %arg9: memref<2x4xf32, #tpu.memory_space<vmem>>, %arg10: memref<2x1xf32, #tpu.memory_space<vmem>>, %arg11: memref<4x2xf32, #tpu.memory_space<vmem>>, %arg12: memref<4x1xf32, #tpu.memory_space<vmem>>, %arg13: memref<1x4x256xf32, #tpu.memory_space<vmem>>, %arg14: memref<2x256xf32, #tpu.memory_space<vmem>>, %arg15: memref<1x256xf32, #tpu.memory_space<vmem>>, %arg16: memref<1x256xf32, #tpu.memory_space<vmem>>, %arg17: memref<2x256xf32, #tpu.memory_space<vmem>>) attributes {dimension_semantics = [#tpu.dimension_semantics<parallel>, #tpu.dimension_semantics<parallel>, #tpu.dimension_semantics<arbitrary>], iteration_bounds = array<i64: 2, 1, 1>, scalar_prefetch = 0 : i64, scratch_operands = 4 : i64, tpu.core_type = #tpu.core_type<tc>, window_params = [{transform_indices = @transform_0, window_bounds = array<i64: 1, 4, 256>}, {transform_indices = @transform_1, window_bounds = array<i64: 1, 4, 256>}, {pipeline_mode = #tpu.pipeline_mode<synchronous>, transform_indices = @transform_2, window_bounds = array<i64: 2, 4>}, {pipeline_mode = #tpu.pipeline_mode<synchronous>, transform_indices = @transform_3, window_bounds = array<i64: 2, 1>}, {pipeline_mode = #tpu.pipeline_mode<synchronous>, transform_indices = @transform_4, window_bounds = array<i64: 2, 4>}, {pipeline_mode = #tpu.pipeline_mode<synchronous>, transform_indices = @transform_5, window_bounds = array<i64: 2, 1>}, {pipeline_mode = #tpu.pipeline_mode<synchronous>, transform_indices = @transform_6, window_bounds = array<i64: 2, 4>}, {pipeline_mode = #tpu.pipeline_mode<synchronous>, transform_indices = @transform_7, window_bounds = array<i64: 2, 1>}, {pipeline_mode = #tpu.pipeline_mode<synchronous>, transform_indices = @transform_8, window_bounds = array<i64: 4, 2>}, {pipeline_mode = #tpu.pipeline_mode<synchronous>, transform_indices = @transform_9, window_bounds = array<i64: 4, 1>}, {transform_indices = @transform_10, window_bounds = array<i64: 1, 4, 256>}]} {
    %c0_i32 = arith.constant 0 : i32
    %0 = arith.cmpi eq, %arg2, %c0_i32 : i32
    %1 = arith.extui %0 : i1 to i32
    %c0_i32_0 = arith.constant 0 : i32
    %2 = arith.cmpi ne, %1, %c0_i32_0 : i32
    scf.if %2 {
      %c0_32 = arith.constant 0 : index
      %c0_33 = arith.constant 0 : index
      %c0_34 = arith.constant 0 : index
      %46 = vector.load %arg3[%c0_32, %c0_33, %c0_34] : memref<1x4x256xf32, #tpu.memory_space<vmem>>, vector<1x4x256xf32>
      %47 = vector.shape_cast %46 : vector<1x4x256xf32> to vector<4x256xf32>
      %c0_35 = arith.constant 0 : index
      %c0_36 = arith.constant 0 : index
      %48 = vector.load %arg7[%c0_35, %c0_36] : memref<2x4xf32, #tpu.memory_space<vmem>>, vector<2x4xf32>
      %cst_37 = arith.constant dense<0.000000e+00> : vector<2x256xf32>
      %49 = tpu.matmul %48, %47, %cst_37 {dimension_numbers = #tpu.dot_dimension_numbers<[1], [0], [0], [1], [0, 0, 1, 1], [], []>} : vector<2x4xf32>, vector<4x256xf32>, vector<2x256xf32> -> vector<2x256xf32>
      %c0_38 = arith.constant 0 : index
      %c0_39 = arith.constant 0 : index
      %50 = vector.load %arg8[%c0_38, %c0_39] : memref<2x1xf32, #tpu.memory_space<vmem>>, vector<2x1xf32>
      %51 = vector.broadcast %50 : vector<2x1xf32> to vector<2x256xf32>
      %52 = arith.addf %49, %51 : vector<2x256xf32>
      %c0_40 = arith.constant 0 : index
      %c0_41 = arith.constant 0 : index
      %53 = vector.load %arg14[%c0_40, %c0_41] : memref<2x256xf32, #tpu.memory_space<vmem>>, vector<2x256xf32>
      tpu.vector_store %arg14[%c0_40, %c0_41], %52 {strides = array<i32>} : memref<2x256xf32, #tpu.memory_space<vmem>>, vector<2x256xf32>,
      %cst_42 = arith.constant 0xFF800000 : f32
      %54 = vector.broadcast %cst_42 : f32 to vector<1x256xf32>
      %c0_43 = arith.constant 0 : index
      %c0_44 = arith.constant 0 : index
      %55 = vector.load %arg15[%c0_43, %c0_44] : memref<1x256xf32, #tpu.memory_space<vmem>>, vector<1x256xf32>
      tpu.vector_store %arg15[%c0_43, %c0_44], %54 {strides = array<i32>} : memref<1x256xf32, #tpu.memory_space<vmem>>, vector<1x256xf32>,
      %cst_45 = arith.constant 0.000000e+00 : f32
      %56 = vector.broadcast %cst_45 : f32 to vector<1x256xf32>
      %c0_46 = arith.constant 0 : index
      %c0_47 = arith.constant 0 : index
      %57 = vector.load %arg16[%c0_46, %c0_47] : memref<1x256xf32, #tpu.memory_space<vmem>>, vector<1x256xf32>
      tpu.vector_store %arg16[%c0_46, %c0_47], %56 {strides = array<i32>} : memref<1x256xf32, #tpu.memory_space<vmem>>, vector<1x256xf32>,
      %cst_48 = arith.constant 0.000000e+00 : f32
      %58 = vector.broadcast %cst_48 : f32 to vector<2x256xf32>
      %c0_49 = arith.constant 0 : index
      %c0_50 = arith.constant 0 : index
      %59 = vector.load %arg17[%c0_49, %c0_50] : memref<2x256xf32, #tpu.memory_space<vmem>>, vector<2x256xf32>
      tpu.vector_store %arg17[%c0_49, %c0_50], %58 {strides = array<i32>} : memref<2x256xf32, #tpu.memory_space<vmem>>, vector<2x256xf32>,
    } else {
    }
    %c0 = arith.constant 0 : index
    %c0_1 = arith.constant 0 : index
    %c0_2 = arith.constant 0 : index
    %3 = vector.load %arg4[%c0, %c0_1, %c0_2] : memref<1x4x256xf32, #tpu.memory_space<vmem>>, vector<1x4x256xf32>
    %4 = vector.shape_cast %3 : vector<1x4x256xf32> to vector<4x256xf32>
    %c0_3 = arith.constant 0 : index
    %c0_4 = arith.constant 0 : index
    %5 = vector.load %arg9[%c0_3, %c0_4] : memref<2x4xf32, #tpu.memory_space<vmem>>, vector<2x4xf32>
    %cst = arith.constant dense<0.000000e+00> : vector<2x256xf32>
    %6 = tpu.matmul %5, %4, %cst {dimension_numbers = #tpu.dot_dimension_numbers<[1], [0], [0], [1], [0, 0, 1, 1], [], []>} : vector<2x4xf32>, vector<4x256xf32>, vector<2x256xf32> -> vector<2x256xf32>
    %c0_5 = arith.constant 0 : index
    %c0_6 = arith.constant 0 : index
    %7 = vector.load %arg10[%c0_5, %c0_6] : memref<2x1xf32, #tpu.memory_space<vmem>>, vector<2x1xf32>
    %8 = vector.broadcast %7 : vector<2x1xf32> to vector<2x256xf32>
    %9 = arith.addf %6, %8 : vector<2x256xf32>
    %c0_7 = arith.constant 0 : index
    %c0_8 = arith.constant 0 : index
    %10 = vector.load %arg5[%c0_7, %c0_8] : memref<2x4xf32, #tpu.memory_space<vmem>>, vector<2x4xf32>
    %cst_9 = arith.constant dense<0.000000e+00> : vector<2x256xf32>
    %11 = tpu.matmul %10, %4, %cst_9 {dimension_numbers = #tpu.dot_dimension_numbers<[1], [0], [0], [1], [0, 0, 1, 1], [], []>} : vector<2x4xf32>, vector<4x256xf32>, vector<2x256xf32> -> vector<2x256xf32>
    %c0_10 = arith.constant 0 : index
    %c0_11 = arith.constant 0 : index
    %12 = vector.load %arg6[%c0_10, %c0_11] : memref<2x1xf32, #tpu.memory_space<vmem>>, vector<2x1xf32>
    %13 = vector.broadcast %12 : vector<2x1xf32> to vector<2x256xf32>
    %14 = arith.addf %11, %13 : vector<2x256xf32>
    %c0_12 = arith.constant 0 : index
    %c0_13 = arith.constant 0 : index
    %15 = vector.load %arg14[%c0_12, %c0_13] : memref<2x256xf32, #tpu.memory_space<vmem>>, vector<2x256xf32>
    %16 = arith.truncf %9 : vector<2x256xf32> to vector<2x256xbf16>
    %17 = arith.truncf %15 : vector<2x256xf32> to vector<2x256xbf16>
    %cst_14 = arith.constant dense<0.000000e+00> : vector<256x256xf32>
    %18 = tpu.matmul %16, %17, %cst_14 {dimension_numbers = #tpu.dot_dimension_numbers<[0], [0], [1], [1], [0, 1, 1, 1], [], []>} : vector<2x256xbf16>, vector<2x256xbf16>, vector<256x256xf32> -> vector<256x256xf32>
    %c0_15 = arith.constant 0 : index
    %c0_16 = arith.constant 0 : index
    %19 = vector.load %arg15[%c0_15, %c0_16] : memref<1x256xf32, #tpu.memory_space<vmem>>, vector<1x256xf32>
    %cst_17 = arith.constant dense<0xFF800000> : vector<256xf32>
    %20 = vector.multi_reduction <maximumf>, %18, %cst_17 [0] : vector<256x256xf32> to vector<256xf32>
    %21 = vector.shape_cast %20 : vector<256xf32> to vector<1x256xf32>
    %22 = arith.maximumf %19, %21 : vector<1x256xf32>
    %23 = arith.subf %19, %22 : vector<1x256xf32>
    %24 = math.exp %23 : vector<1x256xf32>
    %25 = vector.broadcast %22 : vector<1x256xf32> to vector<256x256xf32>
    %26 = arith.subf %18, %25 : vector<256x256xf32>
    %27 = math.exp %26 : vector<256x256xf32>
    %c0_18 = arith.constant 0 : index
    %c0_19 = arith.constant 0 : index
    %28 = vector.load %arg16[%c0_18, %c0_19] : memref<1x256xf32, #tpu.memory_space<vmem>>, vector<1x256xf32>
    %29 = arith.mulf %24, %28 : vector<1x256xf32>
    %cst_20 = arith.constant dense<0.000000e+00> : vector<256xf32>
    %30 = vector.multi_reduction <add>, %27, %cst_20 [0] : vector<256x256xf32> to vector<256xf32>
    %31 = vector.shape_cast %30 : vector<256xf32> to vector<1x256xf32>
    %32 = arith.addf %29, %31 : vector<1x256xf32>
    %c0_21 = arith.constant 0 : index
    %c0_22 = arith.constant 0 : index
    %33 = vector.load %arg16[%c0_21, %c0_22] : memref<1x256xf32, #tpu.memory_space<vmem>>, vector<1x256xf32>
    tpu.vector_store %arg16[%c0_21, %c0_22], %32 {strides = array<i32>} : memref<1x256xf32, #tpu.memory_space<vmem>>, vector<1x256xf32>,
    %c0_23 = arith.constant 0 : index
    %c0_24 = arith.constant 0 : index
    %34 = vector.load %arg17[%c0_23, %c0_24] : memref<2x256xf32, #tpu.memory_space<vmem>>, vector<2x256xf32>
    %35 = vector.broadcast %24 : vector<1x256xf32> to vector<2x256xf32>
    %36 = arith.mulf %35, %34 : vector<2x256xf32>
    %37 = arith.truncf %14 : vector<2x256xf32> to vector<2x256xbf16>
    %38 = arith.truncf %27 : vector<256x256xf32> to vector<256x256xbf16>
    %cst_25 = arith.constant dense<0.000000e+00> : vector<2x256xf32>
    %39 = tpu.matmul %37, %38, %cst_25 {dimension_numbers = #tpu.dot_dimension_numbers<[1], [0], [0], [1], [0, 0, 1, 1], [], []>} : vector<2x256xbf16>, vector<256x256xbf16>, vector<2x256xf32> -> vector<2x256xf32>
    %40 = arith.addf %36, %39 : vector<2x256xf32>
    %c0_26 = arith.constant 0 : index
    %c0_27 = arith.constant 0 : index
    %41 = vector.load %arg17[%c0_26, %c0_27] : memref<2x256xf32, #tpu.memory_space<vmem>>, vector<2x256xf32>
    tpu.vector_store %arg17[%c0_26, %c0_27], %40 {strides = array<i32>} : memref<2x256xf32, #tpu.memory_space<vmem>>, vector<2x256xf32>,
    %c0_28 = arith.constant 0 : index
    %c0_29 = arith.constant 0 : index
    %42 = vector.load %arg15[%c0_28, %c0_29] : memref<1x256xf32, #tpu.memory_space<vmem>>, vector<1x256xf32>
    tpu.vector_store %arg15[%c0_28, %c0_29], %22 {strides = array<i32>} : memref<1x256xf32, #tpu.memory_space<vmem>>, vector<1x256xf32>,
    %c0_i32_30 = arith.constant 0 : i32
    %43 = arith.cmpi eq, %arg2, %c0_i32_30 : i32
    %44 = arith.extui %43 : i1 to i32
    %c0_i32_31 = arith.constant 0 : i32
    %45 = arith.cmpi ne, %44, %c0_i32_31 : i32
    scf.if %45 {
      %c0_32 = arith.constant 0 : index
      %c0_33 = arith.constant 0 : index
      %c0_34 = arith.constant 0 : index
      %46 = vector.load %arg3[%c0_32, %c0_33, %c0_34] : memref<1x4x256xf32, #tpu.memory_space<vmem>>, vector<1x4x256xf32>
      %47 = vector.shape_cast %46 : vector<1x4x256xf32> to vector<4x256xf32>
      %c0_35 = arith.constant 0 : index
      %c0_36 = arith.constant 0 : index
      %48 = vector.load %arg17[%c0_35, %c0_36] : memref<2x256xf32, #tpu.memory_space<vmem>>, vector<2x256xf32>
      %c0_37 = arith.constant 0 : index
      %c0_38 = arith.constant 0 : index
      %49 = vector.load %arg16[%c0_37, %c0_38] : memref<1x256xf32, #tpu.memory_space<vmem>>, vector<1x256xf32>
      %50 = tpu.reciprocal %49 {approx = true} : vector<1x256xf32> -> vector<1x256xf32>
      %51 = vector.broadcast %50 : vector<1x256xf32> to vector<2x256xf32>
      %52 = arith.mulf %48, %51 : vector<2x256xf32>
      %c0_39 = arith.constant 0 : index
      %c0_40 = arith.constant 0 : index
      %53 = vector.load %arg11[%c0_39, %c0_40] : memref<4x2xf32, #tpu.memory_space<vmem>>, vector<4x2xf32>
      %cst_41 = arith.constant dense<0.000000e+00> : vector<4x256xf32>
      %54 = tpu.matmul %53, %52, %cst_41 {dimension_numbers = #tpu.dot_dimension_numbers<[1], [0], [0], [1], [0, 0, 1, 1], [], []>} : vector<4x2xf32>, vector<2x256xf32>, vector<4x256xf32> -> vector<4x256xf32>
      %c0_42 = arith.constant 0 : index
      %c0_43 = arith.constant 0 : index
      %55 = vector.load %arg12[%c0_42, %c0_43] : memref<4x1xf32, #tpu.memory_space<vmem>>, vector<4x1xf32>
      %56 = vector.broadcast %55 : vector<4x1xf32> to vector<4x256xf32>
      %57 = arith.addf %54, %56 : vector<4x256xf32>
      %58 = arith.addf %57, %47 : vector<4x256xf32>
      %c0_44 = arith.constant 0 : index
      %c0_45 = arith.constant 0 : index
      %c0_46 = arith.constant 0 : index
      %59 = vector.load %arg13[%c0_44, %c0_45, %c0_46] : memref<1x4x256xf32, #tpu.memory_space<vmem>>, vector<1x4x256xf32>
      %60 = vector.shape_cast %59 : vector<1x4x256xf32> to vector<4x256xf32>
      %61 = vector.shape_cast %58 : vector<4x256xf32> to vector<1x4x256xf32>
      tpu.vector_store %arg13[%c0_44, %c0_45, %c0_46], %61 {strides = array<i32>} : memref<1x4x256xf32, #tpu.memory_space<vmem>>, vector<1x4x256xf32>,
    } else {
    }
    return
  }
  func.func @transform_0(%arg0: i32, %arg1: i32, %arg2: i32) -> (i32, i32, i32) {
    %c0_i32 = arith.constant 0 : i32
    %c0_i32_0 = arith.constant 0 : i32
    return %arg0, %c0_i32, %arg1 : i32, i32, i32
  }
  func.func @transform_1(%arg0: i32, %arg1: i32, %arg2: i32) -> (i32, i32, i32) {
    %c0_i32 = arith.constant 0 : i32
    %c0_i32_0 = arith.constant 0 : i32
    return %arg0, %c0_i32, %arg2 : i32, i32, i32
  }
  func.func @transform_2(%arg0: i32, %arg1: i32, %arg2: i32) -> (i32, i32) {
    %c0_i32 = arith.constant 0 : i32
    %c0_i32_0 = arith.constant 0 : i32
    %c0_i32_1 = arith.constant 0 : i32
    return %c0_i32, %c0_i32_0 : i32, i32
  }
  func.func @transform_3(%arg0: i32, %arg1: i32, %arg2: i32) -> (i32, i32) {
    %c0_i32 = arith.constant 0 : i32
    %c0_i32_0 = arith.constant 0 : i32
    %c0_i32_1 = arith.constant 0 : i32
    return %c0_i32, %c0_i32_0 : i32, i32
  }
  func.func @transform_4(%arg0: i32, %arg1: i32, %arg2: i32) -> (i32, i32) {
    %c0_i32 = arith.constant 0 : i32
    %c0_i32_0 = arith.constant 0 : i32
    %c0_i32_1 = arith.constant 0 : i32
    return %c0_i32, %c0_i32_0 : i32, i32
  }
  func.func @transform_5(%arg0: i32, %arg1: i32, %arg2: i32) -> (i32, i32) {
    %c0_i32 = arith.constant 0 : i32
    %c0_i32_0 = arith.constant 0 : i32
    %c0_i32_1 = arith.constant 0 : i32
    return %c0_i32, %c0_i32_0 : i32, i32
  }
  func.func @transform_6(%arg0: i32, %arg1: i32, %arg2: i32) -> (i32, i32) {
    %c0_i32 = arith.constant 0 : i32
    %c0_i32_0 = arith.constant 0 : i32
    %c0_i32_1 = arith.constant 0 : i32
    return %c0_i32, %c0_i32_0 : i32, i32
  }
  func.func @transform_7(%arg0: i32, %arg1: i32, %arg2: i32) -> (i32, i32) {
    %c0_i32 = arith.constant 0 : i32
    %c0_i32_0 = arith.constant 0 : i32
    %c0_i32_1 = arith.constant 0 : i32
    return %c0_i32, %c0_i32_0 : i32, i32
  }
  func.func @transform_8(%arg0: i32, %arg1: i32, %arg2: i32) -> (i32, i32) {
    %c0_i32 = arith.constant 0 : i32
    %c0_i32_0 = arith.constant 0 : i32
    %c0_i32_1 = arith.constant 0 : i32
    return %c0_i32, %c0_i32_0 : i32, i32
  }
  func.func @transform_9(%arg0: i32, %arg1: i32, %arg2: i32) -> (i32, i32) {
    %c0_i32 = arith.constant 0 : i32
    %c0_i32_0 = arith.constant 0 : i32
    %c0_i32_1 = arith.constant 0 : i32
    return %c0_i32, %c0_i32_0 : i32, i32
  }
  func.func @transform_10(%arg0: i32, %arg1: i32, %arg2: i32) -> (i32, i32, i32) {
    %c0_i32 = arith.constant 0 : i32
    %c0_i32_0 = arith.constant 0 : i32
    return %arg0, %c0_i32, %arg1 : i32, i32, i32
  }
}

</mosaic_0001>

<bundles_post_ra>
// kernel: tpu_custom_call.1
= control target key start
LH: loop header
LB: loop body
LE: loop exit
PB: predicated region body
PF: predicated region fallthrough
CT: control target
= control target key end

     0   :  { %15 = vsyncpa [#allocation7], 0  ;;  %s2921_s0 = inlined_call_operand.hbm [shape: f32[2,4,256], index: 0, kind: input, shape index: {}]   ;;  %s2922_s1 = inlined_call_operand.hbm [shape: f32[2,4,256], index: 1, kind: input, shape index: {}]   ;;  %s2923_s2 = inlined_call_operand.vmem [shape: f32[2,4], index: 2, kind: input, shape index: {}]   ;;  %s2924_s3 = inlined_call_operand.vmem [shape: f32[2,1], index: 3, kind: input, shape index: {}]   ;;  %s2925_s4 = inlined_call_operand.vmem [shape: f32[2,4], index: 4, kind: input, shape index: {}]   ;;  %s2926_s5 = inlined_call_operand.vmem [shape: f32[2,1], index: 5, kind: input, shape index: {}]   ;;  %s2927_s6 = inlined_call_operand.vmem [shape: f32[2,4], index: 6, kind: input, shape index: {}]   ;;  %s2928_s7 = inlined_call_operand.vmem [shape: f32[2,1], index: 7, kind: input, shape index: {}]   ;;  %s2929_s8 = inlined_call_operand.vmem [shape: f32[4,2], index: 8, kind: input, shape index: {}]   ;;  %s2930_s9 = inlined_call_operand.vmem [shape: f32[4,1], index: 9, kind: input, shape index: {}]   ;;  %s2931_s10 = inlined_call_operand.hbm [shape: f32[2,4,256], index: 10, kind: output, shape index: {}]  }
   0x1   :  { %17 = vsyncpa [#allocation7 + $0x1], 0 }
   0x2   :  { %18 = vsyncpa [#allocation10], 0 }
   0x3   :  { %20 = vsyncpa [#allocation10 + $0x1], 0 }
   0x4   :  { %21 = vsyncpa [#allocation8], 0 }
   0x5   :  { %23 = vsyncpa [#allocation8 + $0x1], 0  ;;  %s2096_s13 = smov 0   ;;  %s2098_s14 = smov 0  }
   0x6   :  { %s2100_s15 = smov 0   ;;  %s2102_s16 = smov 0  }
   0x7   :  { %s2104_s17 = smov 0   ;;  %s2106_s18 = smov 0  }
   0x8 LB: > { %2969 = sst [smem:[#allocation15_spill]] %s2016_s13  ;;  %s1613_s19 = sadd.s32 4294967295, %s2036_s18   ;;  %s2036_s18 = sphi %s2106_s18, %s29_s18   ;;  %s2032_s17 = sphi %s2104_s17, %s3060_s17   ;;  %s2028_s16 = sphi %s2102_s16, %s3059_s16   ;;  %s2024_s15 = sphi %s2100_s15, %s3058_s15   ;;  %s2020_s14 = sphi %s2098_s14, %s3062_s14   ;;  %s2016_s13 = sphi %s2096_s13, %s3061_s13  }
   0x9   : > { %2970 = sst [smem:[#allocation16_spill]] %s2024_s15  ;;  %s1614_s20 = sadd.s32 4294967294, %s2036_s18  }
   0xa   : > { %2971 = sst [smem:[#allocation17_spill]] %s2032_s17  ;;  %s48_s21 = sadd.s32 1, %s2032_s17 }
   0xb   : > { %s57_s22 = sadd.s32 1, %s2024_s15  ;;  %p50_p0 = scmp.ge.s32.totalorder %s48_s21, 2 }
   0xc   : > { %p64_p1 = scmp.ne.s32.totalorder %s2024_s15, %s2020_s14  ;;  %p65_p2 = scmp.eq.s32.totalorder %s2036_s18, 0 }
   0xd   : > { %p70_p3 = scmp.ne.s32.totalorder %s2020_s14, %s2016_s13  ;;  %s3064_s21 = smov (%p50_p0, %s48_s21), 0 }
   0xe   : > { %2972 = sst [smem:[#allocation18_spill]] %s3064_s21  ;;  %p2137_p4 = por %p65_p2, %p64_p1 }
   0xf   : > { %p71_p5 = scmp.eq.s32.totalorder %s1613_s19, 0  ;;  %s52_s24 = ssub.s32 %s2032_s17, %s3064_s21 }
  0x10   : > { %p292_p6 = scmp.eq.s32.totalorder %s1613_s19, 1  ;;  %p55_p7 = scmp.eq.s32.totalorder %s52_s24, 0 }
  0x11   : > { %p2143_p8 = por %p71_p5, %p70_p3  ;;  %p298_p10 = scmp.eq.s32.totalorder %s1614_s20, 1 }
  0x12   : > { %p2147_p9 = por %p292_p6, %p64_p1  ;;  %p1616_p12 = scmp.ge.s32.totalorder %s2036_s18, 2 }
  0x13   : > { %s2152_s27 = scalar_select %p55_p7, %s2024_s15, %s57_s22  }
  0x14   : > { %s2975_s26 = scalar_select %p2147_p9, 1, 0 }
  0x15   : > { %2977 = sst [smem:[#allocation20_spill]] %s2152_s27  ;;  %p2154_p11 = por %p298_p10, %p70_p3 }
  0x16   : > { %2976 = sst [smem:[#allocation19_spill]] %s2975_s26  ;;  %p1702_p13 = scmp.lt.s32.totalorder %s2036_s18, 2 }
  0x17   : > { %s2978_s28 = scalar_select %p2154_p11, 1, 0 }
  0x18   : > { %s342_s29 = sand.u32 1, %s2024_s15   ;;  %s1680_s11 = sshll.u32 %s2032_s17, 3 }
  0x19   : > { %2979 = sst [smem:[#allocation21_spill]] %s2978_s28  ;;  %s1617_s30 = sshll.u32 %s342_s29, 3 }
  0x1a   : > { %s353_s24 = scalar_lea.hbm %s2921_s0, %s1680_s11  ;;  %s346_s21 = scalar_lea.vmem [#allocation6], %s1617_s30 }
  0x1b   : > { %s357_s13 = sshll.u32 %s346_s21, 4  ;;  %s355_s26 = sshll.u32 %s353_s24, 4  ;;  %s358_s13 = int_to_ptr.vmem [resolvable:$true] %s357_s13  ;;  %s356_s26 = int_to_ptr.hbm [resolvable:$true] %s355_s26 }
  0x1c   : > { %p1692_p0 = pnand %p1702_p13, %p2137_p4  ;;  %p1623_p1 = scmp.ge.s32.totalorder %s2036_s18, 1 }
  0x1d   : > { %p384_p2 = scmp.lt.s32.totalorder %s2036_s18, 3  ;;  %s343_s20 = scalar_lea.sflag [#allocation7], %s342_s29 }
  0x1e   : > { %1694 = dma.hbm_to_vmem [thread:$0]  (!%p1692_p0), %s356_s26, 128, %s358_s13, %s343_s20  }
  0x1f   : > { %p385_p3 = pnand %p1623_p1, %p384_p2  ;;  %s375_s17 = scalar_lea.hbm %s2922_s1, %s1680_s11 }
  0x20   : > { %s368_s15 = scalar_lea.vmem [#allocation9], %s1617_s30  ;;  %s377_s12 = sshll.u32 %s375_s17, 4  ;;  %s378_s12 = int_to_ptr.hbm [resolvable:$true] %s377_s12 }
  0x21   : > { %s379_s28 = sshll.u32 %s368_s15, 4  ;;  %s365_s21 = scalar_lea.sflag [#allocation10], %s342_s29  ;;  %s380_s28 = int_to_ptr.vmem [resolvable:$true] %s379_s28 }
  0x22   : > { %1697 = dma.hbm_to_vmem [thread:$0]  (!%p1692_p0), %s378_s12, 128, %s380_s28, %s365_s21  }
  0x23   : > { %388 = sbr.rel (%p385_p3) target bundleno = 1187 (0x4a3), region = 60 }
  0x28   : > { %s2173_s23 = sand.u32 1, %s2020_s14  }
  0x29   : > { %s2176_s13 = sshll.u32 %s2173_s23, 3  ;;  %s391_s26 = scalar_lea.sflag [#allocation7], %s2173_s23 }
  0x2a   : > { %s394_s27 = scalar_lea.vmem [#allocation6], %s2176_s13 }
  0x2b   : > { %2003 = dma.done.wait (%p2143_p8), %s391_s26, 128  }
  0x2c   : > { %2005 = vsyncadd (%p2143_p8), %s391_s26, 4294967168  ;;  %s401_s15 = scalar_lea.sflag [#allocation10], %s2173_s23  ;;  %s404_s17 = scalar_lea.vmem [#allocation9], %s2176_s13 }
  0x2d   : > { %2007 = dma.done.wait (%p2143_p8), %s401_s15, 128  }
  0x2e   : > { %2009 = vsyncadd (%p2143_p8), %s401_s15, 4294967168  ;;  %v2038_v0 = vmov 0   ;;  %v455_v1 = vld [vmem:[%s394_s27] sm:$0xff]  ;;  %vm471_vm0 = vcmask 1043456   ;;  %v530_v3 = vld [vmem:[%s404_s17] sm:$0xff]  ;;  %vm467_vm1 = vcmask 31744  }
  0x2f   : > { %1755 = vset.pattern.permute.xlu0 %v2038_v0  ;;  %1757 = vset.pattern.permute.xlu2 %v2038_v0  ;;  %464 = vst [vmem:[#allocation1] ss:$2 sm:$0xff] %v455_v1  ;;  %v532_v2 = vld [vmem:[%s2928_s7] sm:$0x3]  ;;  %vm519_vm2 = vcmask 1041408   ;;  %vm732_vm3 = vcmask 1040384  }
  0x30   : > { %535 = vperm.xlu0 %1755, %v532_v2   ;;  %v456_v4 = vld [vmem:[%s2925_s4] sm:$0x3]  ;;  %vm683_vm4 = vcmask 15360   ;;  %s1682_s30 = sshll.u32 %s2028_s16, 3  ;;  %s446_s20 = scalar_lea.vmem [#allocation11], %s2176_s13 }
  0x31   : > { %v457_v5 = vld [vmem:[%s2926_s5] sm:$0x3]  ;;  %s1495_s19 = scalar_lea.hbm %s2931_s10, %s1682_s30  ;;  %s1497_s22 = sshll.u32 %s446_s20, 4  ;;  %s1498_s22 = int_to_ptr.vmem [resolvable:$true] %s1497_s22 }
  0x32   : > { %v531_v8 = vld [vmem:[%s2927_s6] sm:$0x3]  ;;  %s1499_s12 = sshll.u32 %s1495_s19, 4  ;;  %s1482_s16 = scalar_lea.sflag [#allocation8], %s2173_s23  ;;  %s1500_s12 = int_to_ptr.hbm [resolvable:$true] %s1499_s12 }
  0x33   : > { %v591_v14 = vld [vmem:[%s2923_s2] sm:$0x3]  ;;  %s1970_s13 = scalar_lea.hbm %s2931_s10, 16 }
  0x34   : > { %v592_v50 = vld [vmem:[%s2924_s3] sm:$0x3] }
  0x36   : > { %v466_v6 = vld.sshfl [vmem:[#allocation1 + $0x8] sm:$0xff pattern:$0x75316420]  ;;  %v465_v7 = vld.sshfl [vmem:[#allocation1] sm:$0xff pattern:$0x75316420] }
  0x37   : > { %1629 = vmatpush.msk.msra.mxu1 %vm471_vm0, %v466_v6  ;;  %1627 = vmatpush.msk.msra.mxu0 %vm471_vm0, %v465_v7  ;;  %539 = vst [vmem:[#allocation1] ss:$2 sm:$0xff] %v530_v3 }
  0x38   : > { %1630 = vmatmul.msk.f32.vlgmr.msra.gmra.mxu1 %vm467_vm1, %v456_v4  ;;  %1628 = vmatmul.msk.f32.vlgmr.msra.gmra.mxu0 %vm467_vm1, %v456_v4 }
  0x39   : > { %460 = vperm.xlu0 %1755, %v457_v5  }
  0x3e   : > { %v541_v9 = vld.sshfl [vmem:[#allocation1 + $0x8] sm:$0xff pattern:$0x75316420]  ;;  %v540_v10 = vld.sshfl [vmem:[#allocation1] sm:$0xff pattern:$0x75316420] }
  0x3f   : > { %1633 = vmatpush.msk.msra.mxu3 %vm471_vm0, %v541_v9  ;;  %1631 = vmatpush.msk.msrb.mxu0 %vm471_vm0, %v540_v10  ;;  %598 = vst [vmem:[#allocation1] ss:$2 sm:$0xff] %v530_v3 }
  0x40   : > { %1634 = vmatmul.msk.f32.vlgmr.msra.gmra.mxu3 %vm467_vm1, %v531_v8  ;;  %1632 = vmatmul.msk.f32.vlgmr.msrb.gmra.mxu0 %vm467_vm1, %v531_v8 }
  0x46   : > { %v599_v11 = vld.sshfl [vmem:[#allocation1] sm:$0xff pattern:$0x75316420]  ;;  %v600_v12 = vld.sshfl [vmem:[#allocation1 + $0x8] sm:$0xff pattern:$0x75316420] }
  0x47   : > { %1635 = vmatpush.msk.msra.mxu0 %vm471_vm0, %v599_v11  ;;  %1637 = vmatpush.msk.msrb.mxu1 %vm471_vm0, %v600_v12 }
  0x48   : > { %1636 = vmatmul.msk.f32.vlgmr.msra.gmra.mxu0 %vm467_vm1, %v591_v14  ;;  %1638 = vmatmul.msk.f32.vlgmr.msrb.gmra.mxu1 %vm467_vm1, %v591_v14 }
  0xa2   : > { %v536_v13 = vpop.permute.xlu0 %535 }
  0xab   : > { %v461_v15 = vpop.permute.xlu0 %460 }
  0xb5   : > { %v513_v16 = vpop.f32.mrf.mxu1  ;;  %v493_v17 = vpop.f32.mrf.mxu0 }
  0xb6   : > { %v514_v18 = vadd.f32 %v513_v16, %v461_v15  ;;  %v494_v19 = vadd.f32 %v493_v17, %v461_v15 }
  0xb8   : > { %v518_v20 = vrot.slane %v514_v18, 6 }
  0xba   : > { %v520_v21 = vsel %vm519_vm2, %v494_v19, %v518_v20 }
  0xbb   : > { %522 = vst [vmem:[#allocation2] sm:$0xf] %v520_v21 }
  0xbd   : > { %v568_v22 = vpop.f32.mrf.mxu0 }
  0xbe   : > { %v569_v23 = vadd.f32 %v568_v22, %v536_v13 }
  0xc0   : > { %v649_v26 = vpack.c.bf16 %v569_v23, %v569_v23 }
  0xc2   : > { %v648_v24 = vld [vmem:[#allocation2] sm:$0xf] }
  0xc3   : > { %v588_v25 = vpop.f32.mrf.mxu3  ;;  %652 = vst [vmem:[#allocation1] ss:$4 sm:$0xff] %v648_v24 }
  0xc4   : > { %v589_v27 = vadd.f32 %v588_v25, %v536_v13 }
  0xc5   : > { %v2270_v57 = vpop.f32.mrf.mxu1 }
  0xc6   : > { %v650_v28 = vpack.c.bf16 %v589_v27, %v589_v27  ;;  %2983 = vst [vmem:[#allocation25_spill] sm:$0xff] %v2270_v57 }
  0xc8   : > { %659 = vxpose.binary.xlu1.c.b16.start.end [1/2] (short) %v650_v28, %v649_v26, 128 }
  0xca   : > { %v653_v29 = vld.sshfl [vmem:[#allocation1] sm:$0xff pattern:$0x73625140]  ;;  %v654_v30 = vld.sshfl [vmem:[#allocation1 + $0x8] sm:$0xff pattern:$0x73625140] }
  0xcb   : > { %v657_v31 = vpack.c.bf16 %v653_v29, %v653_v29  ;;  %v658_v32 = vpack.c.bf16 %v654_v30, %v654_v30 }
  0xcd   : > { %v734_v33 = vsel %vm732_vm3, %v657_v31, 0  ;;  %v737_v34 = vsel %vm732_vm3, %v658_v32, 0 }
  0xce   : > { %746 = vmatpush.bf16.msrb.mxu0 %v734_v33  ;;  %1683 = vmatpush.bf16.msra.mxu2 %v734_v33 }
  0xcf   : > { %835 = vmatpush.bf16.msra.mxu1 %v737_v34  ;;  %1684 = vmatpush.bf16.msrb.mxu3 %v737_v34 }
 0x11b   : > { %1756 = vset.pattern.permute.xlu1 %v2038_v0  ;;  %v2284_v0 = vpop.f32.mrf.mxu0 }
 0x11c   : > { %2984 = vst [vmem:[#allocation26_spill] sm:$0xff] %v2284_v0 }
 0x174   : > { %v667_v35 = vpop.trf.xlu1 }
 0x175   : > { %1639 = vmatmul.msk.bf16.vlgmr.msrb.gmra.mxu0 %vm683_vm4, %v667_v35  ;;  %1655 = vmatmul.msk.bf16.vlgmr.msra.gmra.mxu1 %vm683_vm4, %v667_v35 }
 0x17c   : > { %v668_v36 = vpop.trf.xlu1 }
 0x184   : > { %v669_v37 = vpop.trf.xlu1 }
 0x185   : > { %1640 = vmatmul.msk.bf16.gmra.mxu0 %vm683_vm4, %v669_v37  ;;  %1656 = vmatmul.msk.bf16.gmra.mxu1 %vm683_vm4, %v669_v37 }
 0x18c   : > { %v670_v38 = vpop.trf.xlu1 }
 0x192   : > { %595 = vperm.xlu1 %1756, %v592_v50  }
 0x194   : > { %v671_v39 = vpop.trf.xlu1 }
 0x195   : > { %1641 = vmatmul.msk.bf16.gmra.mxu0 %vm683_vm4, %v671_v39  ;;  %1657 = vmatmul.msk.bf16.gmra.mxu1 %vm683_vm4, %v671_v39 }
 0x19c   : > { %v672_v40 = vpop.trf.xlu1 }
 0x1a4   : > { %v673_v41 = vpop.trf.xlu1 }
 0x1a5   : > { %1642 = vmatmul.msk.bf16.gmra.mxu0 %vm683_vm4, %v673_v41  ;;  %1658 = vmatmul.msk.bf16.gmra.mxu1 %vm683_vm4, %v673_v41 }
 0x1ac   : > { %v674_v42 = vpop.trf.xlu1 }
 0x1b4   : > { %v675_v43 = vpop.trf.xlu1 }
 0x1b5   : > { %1643 = vmatmul.msk.bf16.gmra.mxu0 %vm683_vm4, %v675_v43  ;;  %1659 = vmatmul.msk.bf16.gmra.mxu1 %vm683_vm4, %v675_v43 }
 0x1bc   : > { %v676_v44 = vpop.trf.xlu1 }
 0x1c4   : > { %v677_v45 = vpop.trf.xlu1 }
 0x1c5   : > { %1644 = vmatmul.msk.bf16.vlgmr.msra.gmra.mxu2 %vm683_vm4, %v677_v45  ;;  %1660 = vmatmul.msk.bf16.gmra.mxu1 %vm683_vm4, %v677_v45 }
 0x1cc   : > { %v678_v46 = vpop.trf.xlu1 }
 0x1d4   : > { %v679_v47 = vpop.trf.xlu1 }
 0x1d5   : > { %1645 = vmatmul.msk.bf16.gmra.mxu2 %vm683_vm4, %v679_v47  ;;  %1661 = vmatmul.msk.bf16.vlgmr.msrb.gmra.mxu3 %vm683_vm4, %v679_v47 }
 0x1dc   : > { %v680_v48 = vpop.trf.xlu1 }
 0x1e4   : > { %v681_v49 = vpop.trf.xlu1 }
 0x1e5   : > { %1646 = vmatmul.msk.bf16.gmra.mxu2 %vm683_vm4, %v681_v49  ;;  %1662 = vmatmul.msk.bf16.gmra.mxu3 %vm683_vm4, %v681_v49 }
 0x1ec   : > { %v682_v58 = vpop.trf.xlu1 }
 0x1f2   : > { %v2278_v61 = vpop.f32.mrf.mxu1  ;;  %v2292_v4 = vpop.f32.mrf.mxu0 }
 0x1f5   : > { %1647 = vmatmul.msk.bf16.gmra.mxu2 %vm683_vm4, %v668_v36  ;;  %1663 = vmatmul.msk.bf16.gmra.mxu3 %vm683_vm4, %v668_v36 }
 0x1fa   : > { %v2286_v1 = vpop.f32.mrf.mxu1  ;;  %v2300_v8 = vpop.f32.mrf.mxu0 }
 0x202   : > { %v2294_v5 = vpop.f32.mrf.mxu1  ;;  %v2312_v14 = vpop.f32.mrf.mxu0 }
 0x203   : > { %2985 = vst [vmem:[#allocation27_spill] sm:$0xff] %v2294_v5  ;;  %v955_v45 = vmax.f32 %v2278_v61, %v2294_v5 }
 0x204   : > { %2987 = vst [vmem:[#allocation29_spill] sm:$0xff] %v2312_v14 }
 0x205   : > { %1648 = vmatmul.msk.bf16.gmra.mxu2 %vm683_vm4, %v670_v38  ;;  %1664 = vmatmul.msk.bf16.gmra.mxu3 %vm683_vm4, %v670_v38 }
 0x20a   : > { %v2306_v11 = vpop.f32.mrf.mxu1  ;;  %v2320_v18 = vpop.f32.mrf.mxu0 }
 0x20b   : > { %2986 = vst [vmem:[#allocation28_spill] sm:$0xff] %v2306_v11  ;;  %v956_v47 = vmax.f32 %v2286_v1, %v2306_v11 }
 0x20c   : > { %2988 = vst [vmem:[#allocation30_spill] sm:$0xff] %v2320_v18 }
 0x212   : > { %v2314_v15 = vpop.f32.mrf.mxu1  ;;  %v2328_v22 = vpop.f32.mrf.mxu0 }
 0x213   : > { %2991 = vst [vmem:[#allocation33_spill] sm:$0xff] %v2328_v22  ;;  %v957_v49 = vmax.f32 %v955_v45, %v2314_v15 }
 0x215   : > { %1649 = vmatmul.msk.bf16.gmra.mxu2 %vm683_vm4, %v672_v40  ;;  %1665 = vmatmul.msk.bf16.gmra.mxu3 %vm683_vm4, %v672_v40 }
 0x21a   : > { %v2322_v19 = vpop.f32.mrf.mxu1  ;;  %v2336_v26 = vpop.f32.mrf.mxu0 }
 0x21b   : > { %2989 = vst [vmem:[#allocation31_spill] sm:$0xff] %v2322_v19 }
 0x222   : > { %v2330_v23 = vpop.f32.mrf.mxu1  ;;  %v2348_v32 = vpop.f32.mrf.mxu0 }
 0x223   : > { %2992 = vst [vmem:[#allocation34_spill] sm:$0xff] %v2330_v23  ;;  %v959_v5 = vmax.f32 %v957_v49, %v2330_v23  ;;  %v3005_v49 = vmov 0 }
 0x225   : > { %1650 = vmatmul.msk.bf16.gmra.mxu2 %vm683_vm4, %v674_v42  ;;  %1666 = vmatmul.msk.bf16.gmra.mxu3 %vm683_vm4, %v674_v42 }
 0x22a   : > { %v2342_v29 = vpop.f32.mrf.mxu1  ;;  %v2356_v36 = vpop.f32.mrf.mxu0 }
 0x232   : > { %v2350_v33 = vpop.f32.mrf.mxu1  ;;  %v2364_v40 = vpop.f32.mrf.mxu0 }
 0x235   : > { %1651 = vmatmul.msk.bf16.gmra.mxu2 %vm683_vm4, %v676_v44  ;;  %1667 = vmatmul.msk.bf16.gmra.mxu3 %vm683_vm4, %v676_v44  ;;  %v918_v44 = vmax.f32 %v2292_v4, %v2312_v14 }
 0x23a   : > { %v2358_v37 = vpop.f32.mrf.mxu1  ;;  %v2384_v57 = vpop.f32.mrf.mxu0 }
 0x23b   : > { %2999 = vst [vmem:[#allocation41_spill] sm:$0xff] %v2358_v37 }
 0x23c   : > { %3004 = vst [vmem:[#allocation46_spill] sm:$0xff] %v2384_v57 }
 0x242   : > { %v2366_v41 = vpop.f32.mrf.mxu1 }
 0x245   : > { %1652 = vmatmul.msk.bf16.gmra.mxu2 %vm683_vm4, %v678_v46  ;;  %1668 = vmatmul.msk.bf16.gmra.mxu3 %vm683_vm4, %v678_v46  ;;  %v919_v46 = vmax.f32 %v2300_v8, %v2320_v18 }
 0x247   : > { %v921_v50 = vmax.f32 %v919_v46, %v2336_v26  ;;  %v961_v46 = vmax.f32 %v959_v5, %v2350_v33 }
 0x248   : > { %v2256_v51 = vpop.f32.mrf.mxu2 }
 0x249   : > { %2980 = vst [vmem:[#allocation22_spill] sm:$0xff] %v2256_v51  ;;  %v923_v11 = vmax.f32 %v921_v50, %v2356_v36  ;;  %v2039_v50 = vmov -inf  }
 0x250   : > { %v2258_v52 = vpop.f32.mrf.mxu2 }
 0x255   : > { %1653 = vmatmul.msk.bf16.gmra.mxu2 %vm683_vm4, %v680_v48  ;;  %1669 = vmatmul.msk.bf16.gmra.mxu3 %vm683_vm4, %v680_v48  ;;  %v920_v48 = vmax.f32 %v918_v44, %v2328_v22  ;;  %v523_v22 = vlaneseq }
 0x257   : > { %v922_v0 = vmax.f32 %v920_v48, %v2348_v32  ;;  %vm2400_vm5 = vcmp.lt.s32.totalorder %v523_v22, 256 }
 0x258   : > { %v2262_v53 = vpop.f32.mrf.mxu2  ;;  %v2264_v54 = vpop.f32.mrf.mxu3  ;;  %v3006_v49 = vsel %vm2400_vm5, 4294967295, %v3005_v49  ;;  %527 = vst.msk [vmem:[#allocation3] sm:$0x3] %vm2400_vm5, %v2039_v50 }
 0x259   : > { %2981 = vst [vmem:[#allocation23_spill] sm:$0xff] %v2264_v54  ;;  %v924_v45 = vmax.f32 %v922_v0, %v2364_v40  ;;  %v963_v0 = vmax.f32 %v961_v46, %v2366_v41 }
 0x25a   : > { %3007 = vst [vmem:[#allocation47_spill] sm:$0xff] %v3006_v49 }
 0x25b   : > { %v926_v23 = vmax.f32 %v924_v45, %v2256_v51  ;;  %v2040_v51 = vmov 0.0  }
 0x25c   : > { %528 = vst.msk [vmem:[#allocation4] sm:$0x3] %vm2400_vm5, %v2040_v51 }
 0x25d   : > { %529 = vst [vmem:[#allocation5] sm:$0xf] %v2040_v51 }
 0x260   : > { %v2266_v55 = vpop.f32.mrf.mxu2  ;;  %v2268_v56 = vpop.f32.mrf.mxu3 }
 0x261   : > { %2982 = vst [vmem:[#allocation24_spill] sm:$0xff] %v2268_v56 }
 0x265   : > { %1654 = vmatmul.msk.bf16.gmra.mxu2 %vm683_vm4, %v682_v58  ;;  %1670 = vmatmul.msk.bf16.gmra.mxu3 %vm683_vm4, %v682_v58  ;;  %v958_v58 = vmax.f32 %v956_v47, %v2322_v19  ;;  %v2396_v47 = vpop.f32.mrf.mxu1  ;;  %v925_v19 = vmax.f32 %v923_v11, %v2384_v57  ;;  %v928_v11 = vmax.f32 %v926_v23, %v2262_v53 }
 0x267   : > { %v960_v44 = vmax.f32 %v958_v58, %v2342_v29  ;;  %v927_v58 = vmax.f32 %v925_v19, %v2258_v52 }
 0x268   : > { %v2274_v59 = vpop.f32.mrf.mxu2  ;;  %v2276_v60 = vpop.f32.mrf.mxu3 }
 0x269   : > { %v962_v48 = vmax.f32 %v960_v44, %v2358_v37  ;;  %v965_v44 = vmax.f32 %v963_v0, %v2264_v54  ;;  %v929_v22 = vmax.f32 %v927_v58, %v2266_v55  ;;  %v930_v46 = vmax.f32 %v928_v11, %v2274_v59 }
 0x26b   : > { %v964_v5 = vmax.f32 %v962_v48, %v2396_v47  ;;  %v967_v19 = vmax.f32 %v965_v44, %v2276_v60 }
 0x26d   : > { %v966_v37 = vmax.f32 %v964_v5, %v2268_v56 }
 0x270   : > { %v2280_v62 = vpop.f32.mrf.mxu2  ;;  %v2282_v63 = vpop.f32.mrf.mxu3 }
 0x271   : > { %v931_v23 = vmax.f32 %v929_v22, %v2280_v62  ;;  %v968_v48 = vmax.f32 %v966_v37, %v2282_v63 }
 0x278   : > { %v2288_v2 = vpop.f32.mrf.mxu2  ;;  %v2290_v3 = vpop.f32.mrf.mxu3 }
 0x279   : > { %v932_v50 = vmax.f32 %v930_v46, %v2288_v2  ;;  %v969_v0 = vmax.f32 %v967_v19, %v2290_v3 }
 0x280   : > { %v2296_v6 = vpop.f32.mrf.mxu2  ;;  %v2298_v7 = vpop.f32.mrf.mxu3 }
 0x281   : > { %v933_v5 = vmax.f32 %v931_v23, %v2296_v6  ;;  %v970_v58 = vmax.f32 %v968_v48, %v2298_v7 }
 0x288   : > { %v2302_v9 = vpop.f32.mrf.mxu2  ;;  %v2304_v10 = vpop.f32.mrf.mxu3 }
 0x289   : > { %v934_v56 = vmax.f32 %v932_v50, %v2302_v9  ;;  %v971_v54 = vmax.f32 %v969_v0, %v2304_v10 }
 0x290   : > { %v2308_v12 = vpop.f32.mrf.mxu2  ;;  %v2310_v13 = vpop.f32.mrf.mxu3 }
 0x291   : > { %v935_v11 = vmax.f32 %v933_v5, %v2308_v12  ;;  %v972_v44 = vmax.f32 %v970_v58, %v2310_v13 }
 0x298   : > { %v2316_v16 = vpop.f32.mrf.mxu2  ;;  %v2318_v17 = vpop.f32.mrf.mxu3 }
 0x299   : > { %v936_v22 = vmax.f32 %v934_v56, %v2316_v16  ;;  %v973_v51 = vmax.f32 %v971_v54, %v2318_v17 }
 0x2a0   : > { %v2324_v20 = vpop.f32.mrf.mxu2  ;;  %v2326_v21 = vpop.f32.mrf.mxu3 }
 0x2a1   : > { %2990 = vst [vmem:[#allocation32_spill] sm:$0xff] %v2326_v21  ;;  %v937_v37 = vmax.f32 %v935_v11, %v2324_v20  ;;  %v974_v46 = vmax.f32 %v972_v44, %v2326_v21 }
 0x2a8   : > { %v2332_v24 = vpop.f32.mrf.mxu2  ;;  %v2334_v25 = vpop.f32.mrf.mxu3 }
 0x2a9   : > { %v938_v48 = vmax.f32 %v936_v22, %v2332_v24  ;;  %v975_v50 = vmax.f32 %v973_v51, %v2334_v25 }
 0x2b0   : > { %v2338_v27 = vpop.f32.mrf.mxu2  ;;  %v2340_v28 = vpop.f32.mrf.mxu3 }
 0x2b1   : > { %2993 = vst [vmem:[#allocation35_spill] sm:$0xff] %v2338_v27  ;;  %v939_v0 = vmax.f32 %v937_v37, %v2338_v27  ;;  %v976_v5 = vmax.f32 %v974_v46, %v2340_v28  ;;  %v2464_v27 = vld [vmem:[#allocation3] sm:$0x3] }
 0x2b2   : > { %2994 = vst [vmem:[#allocation36_spill] sm:$0xff] %v2340_v28 }
 0x2b3   : > { %3008 = vst [vmem:[#allocation48_spill] sm:$0xff] %v2464_v27 }
 0x2b8   : > { %v2344_v30 = vpop.f32.mrf.mxu2  ;;  %v2346_v31 = vpop.f32.mrf.mxu3 }
 0x2b9   : > { %2995 = vst [vmem:[#allocation37_spill] sm:$0xff] %v2344_v30  ;;  %v940_v56 = vmax.f32 %v938_v48, %v2344_v30  ;;  %v977_v54 = vmax.f32 %v975_v50, %v2346_v31 }
 0x2ba   : > { %2996 = vst [vmem:[#allocation38_spill] sm:$0xff] %v2346_v31 }
 0x2c0   : > { %v2352_v34 = vpop.f32.mrf.mxu2  ;;  %v2354_v35 = vpop.f32.mrf.mxu3 }
 0x2c1   : > { %2997 = vst [vmem:[#allocation39_spill] sm:$0xff] %v2352_v34  ;;  %v941_v58 = vmax.f32 %v939_v0, %v2352_v34  ;;  %v978_v11 = vmax.f32 %v976_v5, %v2354_v35 }
 0x2c2   : > { %2998 = vst [vmem:[#allocation40_spill] sm:$0xff] %v2354_v35 }
 0x2c8   : > { %v2360_v38 = vpop.f32.mrf.mxu2  ;;  %v2362_v39 = vpop.f32.mrf.mxu3 }
 0x2c9   : > { %3000 = vst [vmem:[#allocation42_spill] sm:$0xff] %v2360_v38  ;;  %v942_v44 = vmax.f32 %v940_v56, %v2360_v38  ;;  %v979_v21 = vmax.f32 %v977_v54, %v2362_v39 }
 0x2ca   : > { %3001 = vst [vmem:[#allocation43_spill] sm:$0xff] %v2362_v39 }
 0x2d0   : > { %v2368_v42 = vpop.f32.mrf.mxu2  ;;  %v2370_v43 = vpop.f32.mrf.mxu3 }
 0x2d1   : > { %3002 = vst [vmem:[#allocation44_spill] sm:$0xff] %v2368_v42  ;;  %v943_v22 = vmax.f32 %v941_v58, %v2368_v42  ;;  %v980_v51 = vmax.f32 %v978_v11, %v2370_v43 }
 0x2d2   : > { %3003 = vst [vmem:[#allocation45_spill] sm:$0xff] %v2370_v43 }
 0x2d8   : > { %v2388_v14 = vpop.f32.mrf.mxu2  ;;  %v2390_v18 = vpop.f32.mrf.mxu3 }
 0x2d9   : > { %v944_v37 = vmax.f32 %v942_v44, %v2388_v14  ;;  %v981_v46 = vmax.f32 %v979_v21, %v2390_v18 }
 0x2e0   : > { %v2414_v57 = vpop.f32.mrf.mxu2  ;;  %v2416_v45 = vpop.f32.mrf.mxu3 }
 0x2e1   : > { %v945_v48 = vmax.f32 %v943_v22, %v2414_v57  ;;  %v982_v50 = vmax.f32 %v980_v51, %v2416_v45 }
 0x2e8   : > { %v2436_v19 = vpop.f32.mrf.mxu2  ;;  %v2438_v23 = vpop.f32.mrf.mxu3 }
 0x2e9   : > { %v946_v5 = vmax.f32 %v944_v37, %v2436_v19  ;;  %v983_v56 = vmax.f32 %v981_v46, %v2438_v23 }
 0x2f0   : > { %v2456_v31 = vpop.f32.mrf.mxu2  ;;  %v2458_v0 = vpop.f32.mrf.mxu3 }
 0x2f1   : > { %v947_v54 = vmax.f32 %v945_v48, %v2456_v31  ;;  %v984_v58 = vmax.f32 %v982_v50, %v2458_v0 }
 0x2f3   : > { %v948_v11 = vmax.f32 %v946_v5, %v947_v54  ;;  %v985_v44 = vmax.f32 %v983_v56, %v984_v58  ;;  %v3011_v54 = vld [vmem:[#allocation27_spill] sm:$0xff] }
 0x2f5   : > { %v949_v43 = vrot.slane %v948_v11, 4  ;;  %v986_v21 = vrot.slane %v985_v44, 4 }
 0x2f7   : > { %v950_v39 = vmax.f32 %v948_v11, %v949_v43  ;;  %v987_v22 = vmax.f32 %v985_v44, %v986_v21  ;;  %v3012_v44 = vld [vmem:[#allocation30_spill] sm:$0xff] }
 0x2f9   : > { %v951_v35 = vrot.slane %v950_v39, 2  ;;  %v988_v51 = vrot.slane %v987_v22, 2 }
 0x2fb   : > { %v952_v34 = vmax.f32 %v950_v39, %v951_v35  ;;  %v989_v30 = vmax.f32 %v987_v22, %v988_v51 }
 0x2fd   : > { %v953_v42 = vrot.slane %v952_v34, 1  ;;  %v990_v38 = vrot.slane %v989_v30, 1 }
 0x2ff   : > { %v991_v28 = vmax.f32 %v989_v30, %v990_v38  ;;  %v954_v37 = vmax.f32 %v952_v34, %v953_v42  ;;  %v3010_v42 = vld [vmem:[#allocation29_spill] sm:$0xff] }
 0x301   : > { %v994_v46 = vrot.slane %v991_v28, 7 }
 0x303   : > { %v995_v48 = vsel %vm732_vm3, %v954_v37, %v994_v46 }
 0x304   : > { %v2468_v50 = vmax.f32 %v2464_v27, %v995_v48  ;;  %v3025_v27 = vld [vmem:[#allocation32_spill] sm:$0xff] }
 0x306   : > { %3009 = vst [vmem:[#allocation49_spill] sm:$0xff] %v2468_v50  ;;  %v2476_v35 = vperm.slane %v2468_v50, 0  ;;  %v2479_v30 = vperm.slane %v2468_v50, 1 }
 0x307   : > { %1394 = vst.msk [vmem:[#allocation3] sm:$0x3] %vm2400_vm5, %v2468_v50 }
 0x308   : > { %v1006_v28 = vsub.f32 %v2292_v4, %v2476_v35  ;;  %v1007_v34 = vsub.f32 %v2278_v61, %v2479_v30  ;;  %v1008_v38 = vsub.f32 %v2300_v8, %v2476_v35  ;;  %v1009_v39 = vsub.f32 %v2286_v1, %v2479_v30  ;;  %v3013_v61 = vld [vmem:[#allocation28_spill] sm:$0xff]  ;;  %v3014_v8 = vld [vmem:[#allocation33_spill] sm:$0xff] }
 0x309   : > { %v1010_v5 = vsub.f32 %v3010_v42, %v2476_v35  ;;  %v1011_v58 = vsub.f32 %v3011_v54, %v2479_v30  ;;  %v1012_v4 = vsub.f32 %v3012_v44, %v2476_v35  ;;  %v1013_v22 = vsub.f32 %v3013_v61, %v2479_v30  ;;  %v3016_v42 = vld [vmem:[#allocation31_spill] sm:$0xff] }
 0x30a   : > { %v1070_v56 = vmul.f32 1.442695, %v1006_v28  ;;  %v1072_v11 = vmul.f32 1.442695, %v1007_v34  ;;  %v1074_v21 = vmul.f32 1.442695, %v1008_v38  ;;  %v1014_v37 = vsub.f32 %v3014_v8, %v2476_v35  ;;  %v2503_v38 = vpop.permute.xlu1 %595 }
 0x30b   : > { %v1076_v51 = vmul.f32 1.442695, %v1009_v39  ;;  %v1078_v1 = vmul.f32 1.442695, %v1010_v5  ;;  %v1015_v46 = vsub.f32 %v2314_v15, %v2479_v30  ;;  %v1080_v48 = vmul.f32 1.442695, %v1011_v58 }
 0x30c   : > { %1758 = vpow2.f32 %v1070_v56  ;;  %v1016_v28 = vsub.f32 %v2336_v26, %v2476_v35  ;;  %v1082_v34 = vmul.f32 1.442695, %v1012_v4  ;;  %3015 = vst [vmem:[#allocation29_spill] sm:$0xff] %v2503_v38  ;;  %v1017_v39 = vsub.f32 %v3016_v42, %v2479_v30  ;;  %v3017_v56 = vld [vmem:[#allocation26_spill] sm:$0xff] }
 0x30d   : > { %1760 = vpow2.f32 %v1072_v11  ;;  %v1084_v54 = vmul.f32 1.442695, %v1013_v22  ;;  %v626_v5 = vadd.f32 %v3017_v56, %v2503_v38  ;;  %v1018_v15 = vsub.f32 %v2348_v32, %v2476_v35  ;;  %v3018_v11 = vld [vmem:[#allocation34_spill] sm:$0xff] }
 0x30e   : > { %1762 = vpow2.f32 %v1074_v21  ;;  %v1086_v58 = vmul.f32 1.442695, %v1014_v37  ;;  %v1019_v26 = vsub.f32 %v3018_v11, %v2479_v30  ;;  %v1088_v44 = vmul.f32 1.442695, %v1015_v46  ;;  %v3020_v56 = vld [vmem:[#allocation46_spill] sm:$0xff] }
 0x30f   : > { %1764 = vpow2.f32 %v1076_v51  ;;  %v1034_v21 = vsub.f32 %v2274_v59, %v2476_v35  ;;  %v1090_v61 = vmul.f32 1.442695, %v1016_v28  ;;  %v1036_v51 = vsub.f32 %v2280_v62, %v2476_v35  ;;  %v3022_v11 = vld [vmem:[#allocation22_spill] sm:$0xff] }
 0x310   : > { %1766 = vpow2.f32 %v1078_v1  ;;  %v1092_v32 = vmul.f32 1.442695, %v1017_v39  ;;  %v2523_v37 = vpack.c.bf16 %v626_v5, %v626_v5  ;;  %v1020_v1 = vsub.f32 %v2356_v36, %v2476_v35 }
 0x311   : > { %1768 = vpow2.f32 %v1080_v48  ;;  %v1094_v46 = vmul.f32 1.442695, %v1018_v15  ;;  %v1021_v59 = vsub.f32 %v2342_v29, %v2479_v30  ;;  %v1030_v28 = vsub.f32 %v2262_v53, %v2476_v35 }
 0x312   : > { %v2513_v4 = vpop.eup %1758  ;;  %1770 = vpow2.f32 %v1082_v34  ;;  %v1096_v62 = vmul.f32 1.442695, %v1019_v26  ;;  %v1022_v42 = vsub.f32 %v2364_v40, %v2476_v35  ;;  %v1032_v36 = vsub.f32 %v2266_v55, %v2476_v35 }
 0x313   : > { %v2517_v22 = vpop.eup %1760  ;;  %1772 = vpow2.f32 %v1084_v54  ;;  %v1126_v39 = vmul.f32 1.442695, %v1034_v21  ;;  %v1023_v29 = vsub.f32 %v2350_v33, %v2479_v30  ;;  %v1024_v53 = vsub.f32 %v3020_v56, %v2476_v35  ;;  %v3023_v56 = vld [vmem:[#allocation23_spill] sm:$0xff] }
 0x314   : > { %v2521_v8 = vpop.eup %1762  ;;  %1774 = vpow2.f32 %v1086_v58  ;;  %v1130_v5 = vmul.f32 1.442695, %v1036_v51  ;;  %v3021_v58 = vld [vmem:[#allocation41_spill] sm:$0xff]  ;;  %v1026_v55 = vsub.f32 %v3022_v11, %v2476_v35  ;;  %v1098_v26 = vmul.f32 1.442695, %v1020_v1 }
 0x315   : > { %v2527_v48 = vpop.eup %1764  ;;  %1776 = vpow2.f32 %v1088_v44  ;;  %v1025_v40 = vsub.f32 %v3021_v58, %v2479_v30  ;;  %v1027_v33 = vsub.f32 %v2366_v41, %v2479_v30  ;;  %v1028_v21 = vsub.f32 %v2258_v52, %v2476_v35  ;;  %v1285_v1 = vld [vmem:[#allocation5] sm:$0xf]  ;;  %v3024_v41 = vld [vmem:[#allocation24_spill] sm:$0xff] }
 0x316   : > { %3019 = vst [vmem:[#allocation27_spill] sm:$0xff] %v2527_v48  ;;  %v2533_v34 = vpop.eup %1766  ;;  %1778 = vpow2.f32 %v1090_v61  ;;  %v1118_v61 = vmul.f32 1.442695, %v1030_v28  ;;  %v1031_v58 = vsub.f32 %v3023_v56, %v2479_v30  ;;  %v1033_v43 = vsub.f32 %v3024_v41, %v2479_v30 }
 0x317   : > { %v2539_v54 = vpop.eup %1768  ;;  %1780 = vpow2.f32 %v1092_v32  ;;  %v1029_v32 = vsub.f32 %v2396_v47, %v2479_v30  ;;  %v1035_v52 = vsub.f32 %v2276_v60, %v2479_v30  ;;  %v1100_v28 = vmul.f32 1.442695, %v1021_v59  ;;  %1292 = vst [vmem:[#allocation1] ss:$4 sm:$0xff] %v1285_v1 }
 0x318   : > { %v2545_v15 = vpop.eup %1770  ;;  %1782 = vpow2.f32 %v1094_v46  ;;  %v1122_v46 = vmul.f32 1.442695, %v1032_v36  ;;  %v1037_v47 = vsub.f32 %v2282_v63, %v2479_v30  ;;  %v1102_v36 = vmul.f32 1.442695, %v1022_v42 }
 0x319   : > { %v2551_v44 = vpop.eup %1772  ;;  %1784 = vpow2.f32 %v1096_v62  ;;  %v1038_v41 = vsub.f32 %v2288_v2, %v2476_v35  ;;  %v1039_v60 = vsub.f32 %v2290_v3, %v2479_v30  ;;  %v1110_v59 = vmul.f32 1.442695, %v1026_v55 }
 0x31a   : > { %v2557_v51 = vpop.eup %1774  ;;  %1786 = vpow2.f32 %v1126_v39  ;;  %v1200_v39 = vadd.f32 %v2521_v8, %v2513_v4  ;;  %v1041_v49 = vsub.f32 %v2298_v7, %v2479_v30  ;;  %v1104_v3 = vmul.f32 1.442695, %v1023_v29 }
 0x31b   : > { %v2563_v11 = vpop.eup %1776  ;;  %1788 = vpow2.f32 %v1130_v5  ;;  %v1108_v2 = vmul.f32 1.442695, %v1025_v40  ;;  %v1237_v63 = vadd.f32 %v2527_v48, %v2517_v22  ;;  %v1128_v7 = vmul.f32 1.442695, %v1035_v52 }
 0x31c   : > { %v2569_v62 = vpop.eup %1778  ;;  %1790 = vpow2.f32 %v1098_v26  ;;  %v1114_v26 = vmul.f32 1.442695, %v1028_v21  ;;  %v1201_v42 = vadd.f32 %v2533_v34, %v1200_v39  ;;  %v1106_v21 = vmul.f32 1.442695, %v1024_v53 }
 0x31d   : > { %v2575_v56 = vpop.eup %1780  ;;  %1792 = vpow2.f32 %v1118_v61  ;;  %v1112_v61 = vmul.f32 1.442695, %v1027_v33  ;;  %v1120_v33 = vmul.f32 1.442695, %v1031_v58 }
 0x31e   : > { %v2581_v5 = vpop.eup %1782  ;;  %1794 = vpow2.f32 %v1122_v46  ;;  %v1202_v46 = vadd.f32 %v2545_v15, %v1201_v42  ;;  %v1116_v42 = vmul.f32 1.442695, %v1029_v32  ;;  %v1140_v32 = vmul.f32 1.442695, %v1041_v49 }
 0x31f   : > { %v2586_v1 = vpop.eup %1784  ;;  %1796 = vpow2.f32 %v1100_v28  ;;  %v1238_v28 = vadd.f32 %v2539_v54, %v1237_v63  ;;  %v3028_v49 = vsub.f32 %v2304_v10, %v2479_v30  ;;  %v3030_v10 = vsub.f32 %v2310_v13, %v2479_v30 }
 0x320   : > { %v2592_v55 = vpop.eup %1786  ;;  %1798 = vpow2.f32 %v1102_v36  ;;  %v1203_v53 = vadd.f32 %v2557_v51, %v1202_v46  ;;  %v1067_v13 = vsub.f32 %v2438_v23, %v2479_v30 }
 0x321   : > { %v2597_v39 = vpop.eup %1788  ;;  %1800 = vpow2.f32 %v1110_v59  ;;  %v1239_v48 = vadd.f32 %v2551_v44, %v1238_v28 }
 0x322   : > { %v2603_v29 = vpop.eup %1790  ;;  %1802 = vpow2.f32 %v1114_v26  ;;  %v1315_v40 = vpack.c.bf16 %v2597_v39, %v2592_v55  ;;  %v1204_v26 = vadd.f32 %v2569_v62, %v1203_v53  ;;  %v1132_v53 = vmul.f32 1.442695, %v1037_v47 }
 0x323   : > { %v2608_v36 = vpop.eup %1792  ;;  %1804 = vpow2.f32 %v1104_v3  ;;  %v1124_v3 = vmul.f32 1.442695, %v1033_v43  ;;  %v1136_v47 = vmul.f32 1.442695, %v1039_v60  ;;  %v1240_v28 = vadd.f32 %v2563_v11, %v1239_v48 }
 0x324   : > { %v2614_v59 = vpop.eup %1794  ;;  %1806 = vpow2.f32 %v1106_v21  ;;  %1333 = vmatpush.bf16.msra.mxu0 %v1315_v40  ;;  %v1205_v58 = vadd.f32 %v2581_v5, %v1204_v26  ;;  %v1134_v40 = vmul.f32 1.442695, %v1038_v41  ;;  %v1062_v26 = vsub.f32 %v2388_v14, %v2476_v35 }
 0x325   : > { %v2619_v46 = vpop.eup %1796  ;;  %1808 = vpow2.f32 %v1108_v2  ;;  %v1313_v2 = vpack.c.bf16 %v2614_v59, %v2608_v36  ;;  %v3026_v41 = vsub.f32 %v2296_v6, %v2476_v35  ;;  %v1063_v48 = vsub.f32 %v2390_v18, %v2479_v30 }
 0x326   : > { %v1799_v50 = vpop.eup %1798  ;;  %1810 = vpow2.f32 %v1112_v61  ;;  %v1206_v38 = vadd.f32 %v2603_v29, %v1205_v58  ;;  %v3027_v14 = vsub.f32 %v2302_v9, %v2476_v35  ;;  %v1065_v9 = vsub.f32 %v2416_v45, %v2479_v30 }
 0x327   : > { %v1801_v21 = vpop.eup %1800  ;;  %1812 = vpow2.f32 %v1116_v42  ;;  %v1066_v45 = vsub.f32 %v2436_v19, %v2476_v35  ;;  %v1068_v19 = vsub.f32 %v2456_v31, %v2476_v35 }
 0x328   : > { %v1803_v43 = vpop.eup %1802  ;;  %1814 = vpow2.f32 %v1120_v33  ;;  %1334 = vmatpush.bf16.msra.mxu0 %v1313_v2  ;;  %v1138_v33 = vmul.f32 1.442695, %v3026_v41  ;;  %v1207_v58 = vadd.f32 %v1799_v50, %v1206_v38  ;;  %v1064_v38 = vsub.f32 %v2414_v57, %v2476_v35 }
 0x329   : > { %v2633_v61 = vpop.eup %1804  ;;  %1816 = vpow2.f32 %v1124_v3  ;;  %v1241_v3 = vadd.f32 %v2575_v56, %v1240_v28  ;;  %v1311_v60 = vpack.c.bf16 %v1803_v43, %v1801_v21  ;;  %v1188_v31 = vmul.f32 1.442695, %v1065_v9 }
 0x32a   : > { %v1807_v42 = vpop.eup %1806  ;;  %1818 = vpow2.f32 %v1128_v7  ;;  %v1142_v7 = vmul.f32 1.442695, %v3027_v14 }
 0x32b   : > { %v2643_v63 = vpop.eup %1808  ;;  %1820 = vpow2.f32 %v1132_v53  ;;  %v1208_v6 = vadd.f32 %v1807_v42, %v1207_v58  ;;  %v1144_v53 = vmul.f32 1.442695, %v3028_v49  ;;  %v1242_v28 = vadd.f32 %v2586_v1, %v1241_v3 }
 0x32c   : > { %v2646_v52 = vpop.eup %1810  ;;  %1822 = vpow2.f32 %v1134_v40  ;;  %1335 = vmatpush.bf16.msra.mxu0 %v1311_v60  ;;  %v3029_v40 = vsub.f32 %v2308_v12, %v2476_v35  ;;  %v1309_v60 = vpack.c.bf16 %v1807_v42, %v1799_v50  ;;  %v3031_v12 = vsub.f32 %v2316_v16, %v2476_v35 }
 0x32d   : > { %v2653_v2 = vpop.eup %1812  ;;  %1824 = vpow2.f32 %v1136_v47  ;;  %v1209_v58 = vadd.f32 %v1801_v21, %v1208_v6  ;;  %v1148_v47 = vmul.f32 1.442695, %v3030_v10  ;;  %v1243_v3 = vadd.f32 %v2619_v46, %v1242_v28 }
 0x32e   : > { %v2661_v18 = vpop.eup %1814  ;;  %1826 = vpow2.f32 %v1138_v33  ;;  %v1146_v41 = vmul.f32 1.442695, %v3029_v40  ;;  %v1150_v21 = vmul.f32 1.442695, %v3031_v12  ;;  %v1186_v49 = vmul.f32 1.442695, %v1064_v38 }
 0x32f   : > { %v2668_v57 = vpop.eup %1816  ;;  %1828 = vpow2.f32 %v1140_v32  ;;  %v1210_v33 = vadd.f32 %v1803_v43, %v1209_v58  ;;  %v1182_v32 = vmul.f32 1.442695, %v1062_v26  ;;  %v1244_v50 = vadd.f32 %v2633_v61, %v1243_v3  ;;  %v3034_v12 = vld [vmem:[#allocation42_spill] sm:$0xff] }
 0x330   : > { %v2674_v14 = vpop.eup %1818  ;;  %1830 = vpow2.f32 %v1142_v7  ;;  %1336 = vmatpush.bf16.msra.mxu0 %v1309_v60  ;;  %v1184_v7 = vmul.f32 1.442695, %v1063_v48  ;;  %v1307_v26 = vpack.c.bf16 %v2603_v29, %v2581_v5  ;;  %v1069_v28 = vsub.f32 %v2458_v0, %v2479_v30  ;;  %v3033_v29 = vld [vmem:[#allocation36_spill] sm:$0xff] }
 0x331   : > { %v2681_v6 = vpop.eup %1820  ;;  %1832 = vpow2.f32 %v1144_v53  ;;  %v1211_v16 = vadd.f32 %v2608_v36, %v1210_v33  ;;  %v1245_v23 = vadd.f32 %v2643_v63, %v1244_v50  ;;  %v3032_v36 = vld [vmem:[#allocation35_spill] sm:$0xff]  ;;  %v1190_v38 = vmul.f32 1.442695, %v1066_v45 }
 0x332   : > { %v2686_v42 = vpop.eup %1822  ;;  %1834 = vpow2.f32 %v1146_v41  ;;  %v1052_v41 = vsub.f32 %v3032_v36, %v2476_v35  ;;  %v1053_v10 = vsub.f32 %v3033_v29, %v2479_v30  ;;  %v1192_v0 = vmul.f32 1.442695, %v1067_v13 }
 0x333   : > { %v2691_v43 = vpop.eup %1824  ;;  %1836 = vpow2.f32 %v1148_v47  ;;  %v1212_v48 = vadd.f32 %v2614_v59, %v1211_v16  ;;  %v1246_v58 = vadd.f32 %v2646_v52, %v1245_v23  ;;  %v1194_v47 = vmul.f32 1.442695, %v1068_v19  ;;  %v3037_v16 = vld [vmem:[#allocation37_spill] sm:$0xff] }
 0x334   : > { %v2696_v53 = vpop.eup %1826  ;;  %1838 = vpow2.f32 %v1150_v21  ;;  %1337 = vmatpush.bf16.msra.mxu0 %v1307_v26  ;;  %v1305_v60 = vpack.c.bf16 %v2569_v62, %v2557_v51  ;;  %v1058_v21 = vsub.f32 %v3034_v12, %v2476_v35  ;;  %v1196_v33 = vmul.f32 1.442695, %v1069_v28 }
 0x335   : > { %v2701_v40 = vpop.eup %1828  ;;  %1840 = vpow2.f32 %v1182_v32  ;;  %v1213_v9 = vadd.f32 %v2592_v55, %v1212_v48  ;;  %v1247_v3 = vadd.f32 %v2653_v2, %v1246_v58  ;;  %v3035_v55 = vld [vmem:[#allocation44_spill] sm:$0xff]  ;;  %v3036_v19 = vsub.f32 %v2324_v20, %v2476_v35 }
 0x336   : > { %v2706_v5 = vpop.eup %1830  ;;  %1842 = vpow2.f32 %v1184_v7  ;;  %v1060_v50 = vsub.f32 %v3035_v55, %v2476_v35  ;;  %v1162_v20 = vmul.f32 1.442695, %v1052_v41  ;;  %v1303_v48 = vpack.c.bf16 %v2545_v15, %v2533_v34 }
 0x337   : > { %v2711_v59 = vpop.eup %1832  ;;  %1844 = vpow2.f32 %v1186_v49  ;;  %v1214_v13 = vadd.f32 %v2597_v39, %v1213_v9  ;;  %v1154_v7 = vmul.f32 1.442695, %v3036_v19  ;;  %v1248_v51 = vadd.f32 %v2661_v18, %v1247_v3 }
 0x338   : > { %v2716_v45 = vpop.eup %1834  ;;  %1846 = vpow2.f32 %v1188_v31  ;;  %1338 = vmatpush.bf16.msra.mxu0 %v1305_v60  ;;  %v1054_v49 = vsub.f32 %v3037_v16, %v2476_v35  ;;  %v3038_v39 = vsub.f32 %v2332_v24, %v2476_v35  ;;  %v1174_v9 = vmul.f32 1.442695, %v1058_v21 }
 0x339   : > { %v2721_v32 = vpop.eup %1836  ;;  %1848 = vpow2.f32 %v1190_v38  ;;  %v1215_v26 = vadd.f32 %v2686_v42, %v1214_v13  ;;  %v1249_v31 = vadd.f32 %v2668_v57, %v1248_v51  ;;  %v3039_v38 = vld [vmem:[#allocation39_spill] sm:$0xff]  ;;  %v3040_v41 = vsub.f32 %v2318_v17, %v2479_v30 }
 0x33a   : > { %v2729_v62 = vpop.eup %1838  ;;  %v1158_v23 = vmul.f32 1.442695, %v3038_v39  ;;  %1850 = vpow2.f32 %v1192_v0  ;;  %v1056_v58 = vsub.f32 %v3039_v38, %v2476_v35  ;;  %v1178_v3 = vmul.f32 1.442695, %v1060_v50 }
 0x33b   : > { %v2737_v28 = vpop.eup %1840  ;;  %1852 = vpow2.f32 %v1194_v47  ;;  %v1216_v24 = vadd.f32 %v2696_v53, %v1215_v26  ;;  %v1152_v47 = vmul.f32 1.442695, %v3040_v41  ;;  %v1250_v60 = vadd.f32 %v2674_v14, %v1249_v31  ;;  %v3044_v31 = vld [vmem:[#allocation40_spill] sm:$0xff] }
 0x33c   : > { %v2742_v36 = vpop.eup %1842  ;;  %1854 = vpow2.f32 %v1196_v33  ;;  %1339 = vmatpush.bf16.msra.mxu0 %v1303_v48  ;;  %v1166_v15 = vmul.f32 1.442695, %v1054_v49  ;;  %v1301_v33 = vpack.c.bf16 %v2521_v8, %v2513_v4  ;;  %v3041_v50 = vsub.f32 %v3025_v27, %v2479_v30  ;;  %v3042_v49 = vld [vmem:[#allocation38_spill] sm:$0xff] }
 0x33d   : > { %v2747_v0 = vpop.eup %1844  ;;  %1856 = vpow2.f32 %v1154_v7  ;;  %v1217_v35 = vadd.f32 %v2706_v5, %v1216_v24  ;;  %v1251_v17 = vadd.f32 %v2681_v6, %v1250_v60  ;;  %v1316_v51 = vpack.c.bf16 %v2681_v6, %v2674_v14 }
 0x33e   : > { %v2753_v34 = vpop.eup %1846  ;;  %1858 = vpow2.f32 %v1158_v23  ;;  %v1329_v12 = vpack.c.bf16 %v2747_v0, %v2737_v28  ;;  %v1156_v19 = vmul.f32 1.442695, %v3041_v50  ;;  %v1055_v4 = vsub.f32 %v3042_v49, %v2479_v30 }
 0x33f   : > { %v2758_v21 = vpop.eup %1848  ;;  %1860 = vpow2.f32 %v1162_v20  ;;  %v1330_v13 = vpack.c.bf16 %v2753_v34, %v2742_v36  ;;  %v1218_v7 = vadd.f32 %v2716_v45, %v1217_v35  ;;  %v1170_v8 = vmul.f32 1.442695, %v1056_v58 }
 0x340   : > { %v2765_v55 = vpop.eup %1850  ;;  %1862 = vpow2.f32 %v1174_v9  ;;  %v1252_v39 = vadd.f32 %v2691_v43, %v1251_v17  ;;  %1340 = vmatpush.bf16.msra.mxu0 %v1301_v33  ;;  %v3043_v27 = vsub.f32 %v2334_v25, %v2479_v30  ;;  %v1057_v48 = vsub.f32 %v3044_v31, %v2479_v30  ;;  %v3046_v33 = vld [vmem:[#allocation45_spill] sm:$0xff] }
 0x341   : > { %v2773_v16 = vpop.eup %1852  ;;  %1864 = vpow2.f32 %v1178_v3  ;;  %v1219_v20 = vadd.f32 %v2729_v62, %v1218_v7  ;;  %v1164_v25 = vmul.f32 1.442695, %v1053_v10  ;;  %v1314_v41 = vpack.c.bf16 %v2668_v57, %v2661_v18 }
 0x342   : > { %v2778_v23 = vpop.eup %1854  ;;  %1866 = vpow2.f32 %v1152_v47  ;;  %v1160_v26 = vmul.f32 1.442695, %v3043_v27  ;;  %v1331_v14 = vpack.c.bf16 %v2773_v16, %v2758_v21  ;;  %v1253_v38 = vadd.f32 %v2701_v40, %v1252_v39 }
 0x343   : > { %v2786_v6 = vpop.eup %1856  ;;  %1868 = vpow2.f32 %v1166_v15  ;;  %v1332_v58 = vpack.c.bf16 %v2778_v23, %v2765_v55  ;;  %1341 = vmatmul.bf16.vlgmr.msra.gmra.mxu0 %v2523_v37  ;;  %v3045_v15 = vld [vmem:[#allocation43_spill] sm:$0xff]  ;;  %v1168_v17 = vmul.f32 1.442695, %v1055_v4  ;;  %v1061_v50 = vsub.f32 %v3046_v33, %v2479_v30 }
 0x344   : > { %1359 = vmatpush.bf16.msrb.mxu0 %v1316_v51  ;;  %v1859_v9 = vpop.eup %1858  ;;  %1870 = vpow2.f32 %v1156_v19  ;;  %v1220_v24 = vadd.f32 %v2786_v6, %v1219_v20  ;;  %1346 = vmatpush.bf16.msrb.mxu1 %v1331_v14  ;;  %v1254_v3 = vadd.f32 %v2711_v59, %v1253_v38  ;;  %v1059_v35 = vsub.f32 %v3045_v15, %v2479_v30 }
 0x345   : > { %v1861_v47 = vpop.eup %1860  ;;  %1872 = vpow2.f32 %v1170_v8  ;;  %v1172_v18 = vmul.f32 1.442695, %v1057_v48  ;;  %v1312_v51 = vpack.c.bf16 %v2653_v2, %v2646_v52  ;;  %v1310_v52 = vpack.c.bf16 %v2643_v63, %v2633_v61 }
 0x346   : > { %v1863_v60 = vpop.eup %1862  ;;  %1874 = vpow2.f32 %v1160_v26  ;;  %v1221_v29 = vadd.f32 %v1859_v9, %v1220_v24  ;;  %v1255_v19 = vadd.f32 %v2721_v32, %v1254_v3  ;;  %v1176_v39 = vmul.f32 1.442695, %v1059_v35 }
 0x347   : > { %v1865_v10 = vpop.eup %1864  ;;  %1876 = vpow2.f32 %v1164_v25  ;;  %v1308_v15 = vpack.c.bf16 %v2619_v46, %v2586_v1  ;;  %v1323_v61 = vpack.c.bf16 %v1861_v47, %v1859_v9  ;;  %v1321_v1 = vpack.c.bf16 %v2786_v6, %v2729_v62  ;;  %v3047_v62 = vld [vmem:[#allocation27_spill] sm:$0xff]  ;;  %v3048_v6 = vld [vmem:[#allocation29_spill] sm:$0xff] }
 0x348   : > { %1360 = vmatpush.bf16.msrb.mxu0 %v1314_v41  ;;  %v2806_v7 = vpop.eup %1866  ;;  %v1222_v57 = vadd.f32 %v1861_v47, %v1221_v29  ;;  %1347 = vmatpush.bf16.msrb.mxu1 %v1329_v12  ;;  %1878 = vpow2.f32 %v1168_v17  ;;  %v1327_v30 = vpack.c.bf16 %v1865_v10, %v1863_v60  ;;  %v1180_v12 = vmul.f32 1.442695, %v1061_v50 }
 0x349   : > { %v1869_v49 = vpop.eup %1868  ;;  %v1256_v4 = vadd.f32 %v2806_v7, %v1255_v19  ;;  %1880 = vpow2.f32 %v1172_v18  ;;  %v1306_v50 = vpack.c.bf16 %v2575_v56, %v2563_v11  ;;  %v1304_v9 = vpack.c.bf16 %v2551_v44, %v2539_v54 }
 0x34a   : > { %v2811_v8 = vpop.eup %1870  ;;  %v1223_v27 = vadd.f32 %v1869_v49, %v1222_v57  ;;  %1882 = vpow2.f32 %v1176_v39  ;;  %v1319_v11 = vpack.c.bf16 %v2716_v45, %v2706_v5  ;;  %v3049_v57 = vld [vmem:[#allocation25_spill] sm:$0xff]  ;;  %v1317_v54 = vpack.c.bf16 %v2696_v53, %v2686_v42  ;;  %v3050_v45 = vld [vmem:[#allocation48_spill] sm:$0xff] }
 0x34b   : > { %v1873_v26 = vpop.eup %1872  ;;  %v1257_v20 = vadd.f32 %v2811_v8, %v1256_v4  ;;  %1884 = vpow2.f32 %v1180_v12  ;;  %v3051_v4 = vld [vmem:[#allocation49_spill] sm:$0xff] }
 0x34c   : > { %1361 = vmatpush.bf16.msrb.mxu0 %v1312_v51  ;;  %v2814_v14 = vpop.eup %1874  ;;  %v1224_v31 = vadd.f32 %v1873_v26, %v1223_v27  ;;  %1348 = vmatpush.bf16.msrb.mxu1 %v1327_v30  ;;  %v1325_v25 = vpack.c.bf16 %v1873_v26, %v1869_v49  ;;  %v3052_v39 = vsub.f32 %v3050_v45, %v3051_v4 }
 0x34d   : > { %v1258_v2 = vadd.f32 %v2814_v14, %v1257_v20  ;;  %v2819_v48 = vpop.eup %1876 }
 0x34e   : > { %v1225_v38 = vadd.f32 %v1863_v60, %v1224_v31  ;;  %v1879_v41 = vpop.eup %1878  ;;  %v999_v27 = vmul.f32 1.442695, %v3052_v39 }
 0x34f   : > { %v1259_v24 = vadd.f32 %v2819_v48, %v1258_v2  ;;  %v1881_v17 = vpop.eup %1880 }
 0x350   : > { %1362 = vmatpush.bf16.msrb.mxu0 %v1310_v52  ;;  %v1226_v3 = vadd.f32 %v1865_v10, %v1225_v38  ;;  %1349 = vmatpush.bf16.msrb.mxu1 %v1325_v25  ;;  %v1883_v33 = vpop.eup %1882  ;;  %1886 = vpow2.f32 %v999_v27  ;;  %v1198_v38 = vld [vmem:[#allocation4] sm:$0x3] }
 0x351   : > { %v1260_v35 = vadd.f32 %v1879_v41, %v1259_v24  ;;  %v1885_v10 = vpop.eup %1884 }
 0x352   : > { %v1227_v63 = vadd.f32 %v2737_v28, %v1226_v3  ;;  %v1328_v12 = vpack.c.bf16 %v1885_v10, %v1883_v33  ;;  %v1324_v3 = vpack.c.bf16 %v2819_v48, %v2814_v14 }
 0x353   : > { %v1261_v29 = vadd.f32 %v1881_v17, %v1260_v35 }
 0x354   : > { %1363 = vmatpush.bf16.msrb.mxu0 %v1308_v15  ;;  %v1228_v60 = vadd.f32 %v2747_v0, %v1227_v63  ;;  %1350 = vmatpush.bf16.msrb.mxu1 %v1323_v61  ;;  %v1318_v15 = vpack.c.bf16 %v2701_v40, %v2691_v43 }
 0x355   : > { %v1262_v19 = vadd.f32 %v1883_v33, %v1261_v29  ;;  %v1293_v33 = vld.sshfl [vmem:[#allocation1] sm:$0xff pattern:$0x73625140] }
 0x356   : > { %v1229_v18 = vadd.f32 %v2758_v21, %v1228_v60  ;;  %v1302_v21 = vpack.c.bf16 %v3047_v62, %v2517_v22  ;;  %v1887_v2 = vpop.eup %1886 }
 0x357   : > { %v1263_v46 = vadd.f32 %v1885_v10, %v1262_v19  ;;  %v1199_v25 = vmul.f32 %v1887_v2, %v1198_v38 }
 0x358   : > { %1364 = vmatpush.bf16.msrb.mxu0 %v1306_v50  ;;  %v1230_v28 = vadd.f32 %v2773_v16, %v1229_v18  ;;  %1351 = vmatpush.bf16.msrb.mxu1 %v1321_v1  ;;  %v646_v16 = vadd.f32 %v3049_v57, %v3048_v6  ;;  %v1409_v6 = vld [vmem:[%s2929_s8] sm:$0xf] }
 0x359   : > { %v1264_v0 = vadd.f32 %v2742_v36, %v1263_v46 }
 0x35a   : > { %v1231_v47 = vrot.slane %v1230_v28, 4  ;;  %v1300_v5 = vpack.c.bf16 %v646_v16, %v646_v16 }
 0x35b   : > { %v1265_v56 = vadd.f32 %v2753_v34, %v1264_v0 }
 0x35c   : > { %1365 = vmatpush.bf16.msrb.mxu0 %v1304_v9  ;;  %1352 = vmatpush.bf16.msrb.mxu1 %v1319_v11  ;;  %v1232_v51 = vadd.f32 %v1231_v47, %v1230_v28 }
 0x35d   : > { %v1266_v49 = vadd.f32 %v2765_v55, %v1265_v56 }
 0x35e   : > { %v1233_v30 = vrot.slane %v1232_v51, 2 }
 0x35f   : > { %v1267_v44 = vadd.f32 %v2778_v23, %v1266_v49  ;;  %v1326_v23 = vpack.c.bf16 %v1881_v17, %v1879_v41  ;;  %v1320_v41 = vpack.c.bf16 %v2721_v32, %v2711_v59  ;;  %v1294_v59 = vld.sshfl [vmem:[#allocation1 + $0x8] sm:$0xff pattern:$0x73625140]  ;;  %v1287_v32 = vperm.slane %v1887_v2, 0 }
 0x360   : > { %1366 = vmatpush.bf16.msrb.mxu0 %v1302_v21  ;;  %1353 = vmatpush.bf16.msrb.mxu1 %v1317_v54  ;;  %v1234_v42 = vadd.f32 %v1233_v30, %v1232_v51  ;;  %v1398_v51 = vld [vmem:[%s394_s27] sm:$0xff]  ;;  %s1964_s27 = sshra.s32 %s1500_s12, 4  ;;  %s1965_s27 = int_to_ptr.hbm [resolvable:$true] %s1964_s27 }
 0x361   : > { %v1268_v22 = vrot.slane %v1267_v44, 4  ;;  %v1297_v19 = vmul.f32 %v1293_v33, %v1287_v32  ;;  %s1966_s21 = scalar_lea.hbm %s1965_s27, 8  ;;  %p1971_p7 = scmp.lt.s32.totalorder %s1965_s27, %s2931_s10 }
 0x362   : > { %v1235_v31 = vrot.slane %v1234_v42, 1  ;;  %p1967_p4 = scmp.ne.s32.totalorder %s1965_s27, %s1966_s21  ;;  %p1972_p8 = scmp.lt.s32.totalorder %s1970_s13, %s1966_s21 }
 0x363   : > { %1367 = vmatmul.bf16.vlgmr.msrb.gmra.mxu0 %v2523_v37  ;;  %v1269_v26 = vadd.f32 %v1268_v22, %v1267_v44  ;;  %1354 = vmatmul.bf16.vlgmr.msrb.gmra.mxu1 %v1300_v5 }
 0x364   : > { %1372 = vmatpush.bf16.msra.mxu1 %v1332_v58  ;;  %v1236_v58 = vadd.f32 %v1235_v31, %v1234_v42  ;;  %p1968_p5 = pnand %p1967_p4, %p2147_p9  ;;  %p1973_p10 = por %p1972_p8, %p1971_p7 }
 0x365   : > { %v1270_v53 = vrot.slane %v1269_v26, 2 }
 0x366   : > { %p1969_p6 = pneg %p1968_p5 }
 0x367   : > { %v1271_v20 = vadd.f32 %v1270_v53, %v1269_v26 }
 0x368   : > { %1373 = vmatpush.bf16.msra.mxu1 %v1330_v13  ;;  %v1322_v13 = vpack.c.bf16 %v2811_v8, %v2806_v7  ;;  %v1410_v7 = vld [vmem:[%s2930_s9] sm:$0xf]  ;;  %v1288_v8 = vperm.slane %v1887_v2, 1  ;;  %p1974_p13 = pnand %p1973_p10, %p1969_p6 }
 0x369   : > { %v1272_v52 = vrot.slane %v1271_v20, 1  ;;  %1413 = vperm.xlu2 %1757, %v1410_v7  }
 0x36a   : > { %v1298_v60 = vmul.f32 %v1294_v59, %v1288_v8 }
 0x36b   : > { %v1273_v55 = vadd.f32 %v1272_v52, %v1271_v20 }
 0x36c   : > { %1374 = vmatpush.bf16.msra.mxu1 %v1328_v12 }
 0x36d   : > { %v1276_v37 = vrot.slane %v1273_v55, 7 }
 0x36f   : > { %v1277_v24 = vsel %vm732_vm3, %v1236_v58, %v1276_v37 }
 0x370   : > { %1375 = vmatpush.bf16.msra.mxu1 %v1326_v23  ;;  %v1279_v36 = vadd.f32 %v1277_v24, %v1199_v25 }
 0x372   : > { %1284 = vst.msk [vmem:[#allocation4] sm:$0x3] %vm2400_vm5, %v1279_v36 }
 0x374   : > { %1376 = vmatpush.bf16.msra.mxu1 %v1324_v3 }
 0x378   : > { %1377 = vmatpush.bf16.msra.mxu1 %v1322_v13 }
 0x379   : > { %v1400_v29 = vld [vmem:[#allocation4] sm:$0x3] }
 0x37a   : > { %1888 = vrcp.f32 %v1400_v29 }
 0x37c   : > { %1378 = vmatpush.bf16.msra.mxu1 %v1320_v41 }
 0x380   : > { %1379 = vmatpush.bf16.msra.mxu1 %v1318_v15  ;;  %v1889_v18 = vpop.eup %1888 }
 0x381   : > { %v1404_v9 = vperm.slane %v1889_v18, 1  ;;  %v1403_v11 = vperm.slane %v1889_v18, 0 }
 0x383   : > { %1380 = vmatmul.bf16.vlgmr.msra.gmra.mxu1 %v1300_v5  ;;  %v1405_v47 = vrot.slane %v1404_v9, 6 }
 0x385   : > { %v1406_v62 = vsel %vm519_vm2, %v1403_v11, %v1405_v47 }
 0x3c0   : > { %v1342_v35 = vpop.f32.mrf.mxu0 }
 0x3c3   : > { %v1414_v49 = vpop.permute.xlu2 %1413 }
 0x3c8   : > { %v1344_v14 = vpop.f32.mrf.mxu0 }
 0x3e0   : > { %v1368_v48 = vpop.f32.mrf.mxu0  ;;  %v1355_v17 = vpop.f32.mrf.mxu1 }
 0x3e1   : > { %v1356_v40 = vadd.f32 %v1355_v17, %v1342_v35 }
 0x3e3   : > { %v1385_v1 = vadd.f32 %v1356_v40, %v1297_v19 }
 0x3e8   : > { %v1370_v63 = vpop.f32.mrf.mxu0  ;;  %v1357_v61 = vpop.f32.mrf.mxu1 }
 0x400   : > { %v1381_v43 = vpop.f32.mrf.mxu1 }
 0x401   : > { %v1382_v50 = vadd.f32 %v1381_v43, %v1368_v48 }
 0x403   : > { %v1386_v10 = vadd.f32 %v1382_v50, %v1298_v60 }
 0x405   : > { %v1389_v46 = vrot.slane %v1386_v10, 6 }
 0x407   : > { %v1391_v28 = vsel %vm519_vm2, %v1385_v1, %v1389_v46 }
 0x408   : > { %1393 = vst [vmem:[#allocation5] sm:$0xf] %v1391_v28  ;;  %v1383_v0 = vpop.f32.mrf.mxu1 }
 0x40f   : > { %v1399_v56 = vld [vmem:[#allocation5] sm:$0xf] }
 0x410   : > { %v1408_v21 = vmul.f32 %v1406_v62, %v1399_v56 }
 0x412   : > { %1417 = vst [vmem:[#allocation1] ss:$4 sm:$0xff] %v1408_v21 }
 0x419   : > { %v1418_v57 = vld.sshfl [vmem:[#allocation1] sm:$0xff pattern:$0x73625140]  ;;  %v1419_v16 = vld.sshfl [vmem:[#allocation1 + $0x8] sm:$0xff pattern:$0x73625140] }
 0x41a   : > { %1671 = vmatpush.msk.msra.mxu0 %vm519_vm2, %v1418_v57  ;;  %1673 = vmatpush.msk.msrb.mxu1 %vm519_vm2, %v1419_v16  ;;  %1468 = vst [vmem:[#allocation1] ss:$2 sm:$0xff] %v1398_v51 }
 0x41b   : > { %1674 = vmatmul.msk.f32.vlgmr.msrb.gmra.mxu1 %vm683_vm4, %v1409_v6  ;;  %1672 = vmatmul.msk.f32.vlgmr.msra.gmra.mxu0 %vm683_vm4, %v1409_v6 }
 0x421   : > { %v1470_v44 = vld.sshfl [vmem:[#allocation1 + $0x8] sm:$0xff pattern:$0x75316420]  ;;  %v1469_v39 = vld.sshfl [vmem:[#allocation1] sm:$0xff pattern:$0x75316420] }
 0x498   : > { %v1464_v54 = vpop.f32.mrf.mxu1  ;;  %v1444_v5 = vpop.f32.mrf.mxu0 }
 0x499   : > { %v1465_v45 = vadd.f32 %v1464_v54, %v1414_v49  ;;  %v1445_v4 = vadd.f32 %v1444_v5, %v1414_v49 }
 0x49b   : > { %v1474_v27 = vadd.f32 %v1470_v44, %v1465_v45  ;;  %v1473_v22 = vadd.f32 %v1469_v39, %v1445_v4 }
 0x49d   : > { %v1477_v30 = vrot.slane %v1474_v27, 4 }
 0x49f   : > { %v1478_v26 = vsel %vm471_vm0, %v1473_v22, %v1477_v30 }
 0x4a0   : > { %1480 = vst [vmem:[%s446_s20] sm:$0xff] %v1478_v26 }
 0x4a1   : > { %1977 = shalt.err (!%p1974_p13)
}
 0x4a2   : > { %1689 = dma.vmem_to_hbm [thread:$0]  (%p2147_p9), %s1498_s22, 128, %s1500_s12, %s1482_s16  }
 0x4a3 PF: > { %s3055_s23 = sld [smem:[#allocation15_spill]]  ;;  %p1699_p0 = pnand %p1616_p12, %p2154_p11 }
 0x4a5   : > { %p1700_p1 = pneg %p1699_p0 }
 0x4a9   : > { %s1511_s30 = sand.u32 1, %s3055_s23  }
 0x4aa   : > { %s1512_s11 = scalar_lea.sflag [#allocation8], %s1511_s30 }
 0x4ab   : > { %2011 = dma.done.wait (%p1700_p1), %s1512_s11, 128  }
 0x4ac   : > { %2013 = vsyncadd (%p1700_p1), %s1512_s11, 4294967168  ;;  %s29_s18 = sadd.s32 1, %s2036_s18   ;;  %s3057_s25 = sld [smem:[#allocation16_spill]] }
 0x4ad   : > { %p26_p2 = scmp.ge.s32.totalorder %s29_s18, 4   ;;  %s3058_s15 = sld [smem:[#allocation20_spill]] }
 0x4ae   : > { %s3059_s16 = sld [smem:[#allocation17_spill]]  ;;  %s3061_s13 = smov %s2020_s14 }
 0x4af   : > { %s3060_s17 = sld [smem:[#allocation18_spill]]  ;;  %28 = sbr.rel (!%p26_p2) target bundleno = 8 (0x8), region = 126 }
 0x4b2   : > { %s3062_s14 = smov %s3057_s25 }
 0x4b4   :  { %1518 = vsyncpa [#allocation7], 1 }
 0x4b5   :  { %1520 = vsyncpa [#allocation7 + $0x1], 1 }
 0x4b6   :  { %1521 = vsyncpa [#allocation10], 1 }
 0x4b7   :  { %1523 = vsyncpa [#allocation10 + $0x1], 1 }
 0x4b8   :  { %1524 = vsyncpa [#allocation8], 1 }
 0x4b9   :  { %1526 = vsyncpa [#allocation8 + $0x1], 1 }

</bundles_post_ra>
